<compile_context>
chip_gen: v7x
topology: tpu7x:2x2x1
jax: 0.10.0
libtpu: 0.0.40
codegen_flags: <defaults>
</compile_context>

<pallas_src>
import functools
import math

import jax
import jax.numpy as jnp
from jax.experimental import pallas as pl
from jax.experimental.pallas import tpu as pltpu


# ----------------------------------------------------------------------------
# Kernel 1: the full LSTM stack.  One grid step == one layer.
# ----------------------------------------------------------------------------
def _lstm_stack_kernel(x_ref, h0_ref, c0_ref, w_ih_ref, w_hh_ref, b_ref,
                       act_ref, hT_ref, cT_ref,
                       gx_sc, h_sc, c_sc,
                       *, seq_len, batch_p, hidden_p):
    Hp = hidden_p
    Bp = batch_p

    # Layer 0 seeds the resident activation slab with the embedded inputs.
    @pl.when(pl.program_id(0) == 0)
    def _():
        act_ref[...] = x_ref[...]

    # (1) cuDNN-style batched input projection for ALL timesteps:
    #     (T*Bp, Hp) @ (Hp, 4Hp), bf16 operands, f32 accumulation,
    #     plus the combined (b_ih + b_hh) bias.
    gx_sc[...] = jnp.dot(act_ref[...], w_ih_ref[0],
                         preferred_element_type=jnp.float32) + b_ref[0]

    h_sc[...] = h0_ref[0]
    c_sc[...] = c0_ref[0]
    w_hh = w_hh_ref[0]                       # (Hp, 4Hp) bf16, loaded once/layer

    # (2) Sequential recurrence; state in f32 scratch.  fori_loop (not a fully
    #     unrolled Python loop) keeps vreg live ranges bounded at larger T.
    def step(t, carry):
        row = pl.multiple_of(t * Bp, Bp)     # Bp is a multiple of 8 -> aligned
        h = h_sc[...]
        c = c_sc[...]
        gates = gx_sc[pl.ds(row, Bp), :] + jnp.dot(
            h.astype(jnp.bfloat16), w_hh, preferred_element_type=jnp.float32)

        # PyTorch gate order [i | f | g | o]; Hp is a multiple of 128 so each
        # gate slice is a vreg-aligned lane tile (no relayout per step).
        i_g = jax.nn.sigmoid(gates[:, 0 * Hp:1 * Hp])
        f_g = jax.nn.sigmoid(gates[:, 1 * Hp:2 * Hp])
        g_g = jnp.tanh(gates[:, 2 * Hp:3 * Hp])
        o_g = jax.nn.sigmoid(gates[:, 3 * Hp:4 * Hp])

        c_new = f_g * c + i_g * g_g
        h_new = o_g * jnp.tanh(c_new)

        h_sc[...] = h_new
        c_sc[...] = c_new
        act_ref[pl.ds(row, Bp), :] = h_new.astype(act_ref.dtype)
        return carry

    jax.lax.fori_loop(0, seq_len, step, 0)

    hT_ref[0] = h_sc[...]
    cT_ref[0] = c_sc[...]


# ----------------------------------------------------------------------------
# Kernel 2: decoder Linear, tiled over (row tiles x vocab tiles).
# ----------------------------------------------------------------------------
def _decoder_kernel(act_ref, w_ref, b_ref, out_ref):
    # Dropout(p=0.2) is identity in eval mode.
    # TODO(synk): training-mode dropout (pltpu.prng_* stochastic mask) not implemented.
    out_ref[...] = (jnp.dot(act_ref[...], w_ref[...],
                            preferred_element_type=jnp.float32)
                    + b_ref[...]).astype(out_ref.dtype)


# ----------------------------------------------------------------------------
# Parameter handling
# ----------------------------------------------------------------------------
def _round_up(x, m):
    return ((x + m - 1) // m) * m


def _vmem_limit(nbytes):
    # 2x for double-buffering + 4 MiB headroom, floor 8 MiB, v7x-safe cap.
    return int(min(max(2 * nbytes + (4 << 20), 8 << 20), 64 << 20))


def init_params(key, num_layers, hidden_size, input_size):
    """PyTorch-faithful f32 parameters (same shapes as the nn.Module)."""
    ks = jax.random.split(key, 2 + 4 * num_layers + 2)
    it = iter(ks)
    H, V = hidden_size, input_size
    stdv = 1.0 / math.sqrt(H)

    emb = jax.random.normal(next(it), (V, H), jnp.float32)
    emb = emb.at[0].set(0.0)                       # padding_idx=0

    w_ih_t, w_hh_t, b = [], [], []
    for _ in range(num_layers):
        w_ih = jax.random.uniform(next(it), (4 * H, H), jnp.float32, -stdv, stdv)
        w_hh = jax.random.uniform(next(it), (4 * H, H), jnp.float32, -stdv, stdv)
        b_ih = jax.random.uniform(next(it), (4 * H,), jnp.float32, -stdv, stdv)
        b_hh = jax.random.uniform(next(it), (4 * H,), jnp.float32, -stdv, stdv)
        w_ih_t.append(w_ih.T)                      # (H, 4H)
        w_hh_t.append(w_hh.T)                      # (H, 4H)
        b.append((b_ih + b_hh).reshape(1, 4 * H))  # combined bias

    w_dec = jax.random.uniform(next(it), (V, H), jnp.float32, -stdv, stdv)
    b_dec = jax.random.uniform(next(it), (V,), jnp.float32, -stdv, stdv)

    return {
        "num_layers": num_layers,
        "emb": emb,
        "w_ih_t": jnp.stack(w_ih_t),               # (L, H, 4H)
        "w_hh_t": jnp.stack(w_hh_t),               # (L, H, 4H)
        "b": jnp.stack(b),                         # (L, 1, 4H)
        "w_dec_t": w_dec.T,                        # (H, V)
        "b_dec": b_dec.reshape(1, V),              # (1, V)
    }


def prepare_params(params, *, lane=128):
    """One-time layout prep (hoisted out of the forward path): pad each gate's
    hidden dim and the vocab dim to lane tiles, cast matmul operands to bf16."""
    L = int(params["num_layers"])
    H = params["emb"].shape[1]
    V = params["w_dec_t"].shape[1]
    Hp = _round_up(H, lane)
    Vp = _round_up(V, lane)

    def pad_gate_mat(w_t):                         # (H, 4H) -> (Hp, 4Hp)
        blocks = jnp.split(w_t, 4, axis=1)
        blocks = [jnp.pad(blk, ((0, Hp - H), (0, Hp - H))) for blk in blocks]
        return jnp.concatenate(blocks, axis=1)

    def pad_gate_bias(bv):                         # (1, 4H) -> (1, 4Hp)
        blocks = jnp.split(bv, 4, axis=1)
        blocks = [jnp.pad(blk, ((0, 0), (0, Hp - H))) for blk in blocks]
        return jnp.concatenate(blocks, axis=1)

    w_ih_p = jnp.stack([pad_gate_mat(params["w_ih_t"][l]) for l in range(L)])
    w_hh_p = jnp.stack([pad_gate_mat(params["w_hh_t"][l]) for l in range(L)])
    b_p = jnp.stack([pad_gate_bias(params["b"][l]) for l in range(L)])

    w_dec_p = jnp.pad(params["w_dec_t"], ((0, Hp - H), (0, Vp - V)))
    b_dec_p = jnp.pad(params["b_dec"], ((0, 0), (0, Vp - V)))

    return {
        "num_layers": L, "H": H, "V": V, "Hp": Hp, "Vp": Vp,
        "emb": params["emb"],
        "w_ih_p": w_ih_p.astype(jnp.bfloat16),     # (L, Hp, 4Hp)
        "w_hh_p": w_hh_p.astype(jnp.bfloat16),     # (L, Hp, 4Hp)
        "b_p": b_p.astype(jnp.float32),            # (L, 1, 4Hp)
        "w_dec_p": w_dec_p.astype(jnp.bfloat16),   # (Hp, Vp)
        "b_dec_p": b_dec_p.astype(jnp.float32),    # (1, Vp)
    }


# ----------------------------------------------------------------------------
# RNN forward (matches the PyTorch module's forward, eval mode)
# ----------------------------------------------------------------------------
def rnn_forward(prep, x_ids, h, *, slice_output=True):
    """x_ids: (T, B) int32; h = (h0, c0), each (num_layers, B, H) f32."""
    h0, c0 = h
    T, B = x_ids.shape
    L, H, V = prep["num_layers"], prep["H"], prep["V"]
    Hp, Vp = prep["Hp"], prep["Vp"]
    Bp = _round_up(B, 8)                           # sublane-aligned batch

    # Embedding gather (padding_idx=0 via zeroed row 0) — plain-JAX glue —
    # then pad batch/hidden and cast to bf16 (only feeds bf16 matmuls).
    x = jnp.take(prep["emb"], x_ids, axis=0)                        # (T, B, H)
    x = jnp.pad(x, ((0, 0), (0, Bp - B), (0, Hp - H)))
    x = x.reshape(T * Bp, Hp).astype(jnp.bfloat16)

    h0p = jnp.pad(h0, ((0, 0), (0, Bp - B), (0, Hp - H)))
    c0p = jnp.pad(c0, ((0, 0), (0, Bp - B), (0, Hp - H)))

    # ---- LSTM stack: grid over layers; state & activations stay in VMEM ----
    lstm_bytes = (2 * T * Bp * Hp * 2              # x in + act out (bf16)
                  + 4 * Bp * Hp * 4                # h0/c0 + hT/cT blocks
                  + 2 * Hp * 4 * Hp * 2            # W_ih + W_hh blocks (bf16)
                  + 4 * Hp * 4                     # bias block
                  + T * Bp * 4 * Hp * 4            # gx scratch (f32)
                  + 2 * Bp * Hp * 4)               # h/c scratch (f32)

    lstm_kernel = functools.partial(
        _lstm_stack_kernel, seq_len=T, batch_p=Bp, hidden_p=Hp)

    act, hT, cT = pl.pallas_call(
        lstm_kernel,
        out_shape=(jax.ShapeDtypeStruct((T * Bp, Hp), jnp.bfloat16),
                   jax.ShapeDtypeStruct((L, Bp, Hp), jnp.float32),
                   jax.ShapeDtypeStruct((L, Bp, Hp), jnp.float32)),
        grid_spec=pltpu.PrefetchScalarGridSpec(
            num_scalar_prefetch=0,
            grid=(L,),
            in_specs=[
                pl.BlockSpec((T * Bp, Hp), lambda l: (0, 0)),        # x (flat)
                pl.BlockSpec((1, Bp, Hp), lambda l: (l, 0, 0)),      # h0[l]
                pl.BlockSpec((1, Bp, Hp), lambda l: (l, 0, 0)),      # c0[l]
                pl.BlockSpec((1, Hp, 4 * Hp), lambda l: (l, 0, 0)),  # W_ih^T[l]
                pl.BlockSpec((1, Hp, 4 * Hp), lambda l: (l, 0, 0)),  # W_hh^T[l]
                pl.BlockSpec((1, 1, 4 * Hp), lambda l: (l, 0, 0)),   # bias[l]
            ],
            out_specs=[
                pl.BlockSpec((T * Bp, Hp), lambda l: (0, 0)),        # act slab
                pl.BlockSpec((1, Bp, Hp), lambda l: (l, 0, 0)),      # h_T[l]
                pl.BlockSpec((1, Bp, Hp), lambda l: (l, 0, 0)),      # c_T[l]
            ],
            scratch_shapes=[
                pltpu.VMEM((T * Bp, 4 * Hp), jnp.float32),   # x-projection gates
                pltpu.VMEM((Bp, Hp), jnp.float32),           # h carry
                pltpu.VMEM((Bp, Hp), jnp.float32),           # c carry
            ]),
        compiler_params=pltpu.CompilerParams(
            dimension_semantics=("arbitrary",),              # layers: sequential
            vmem_limit_bytes=_vmem_limit(lstm_bytes)),
    )(x, h0p, c0p, prep["w_ih_p"], prep["w_hh_p"], prep["b_p"])

    # ---- Decoder Linear: tiled (rows x vocab), both grid axes parallel -----
    rows = T * Bp
    tm = min(rows, 256)
    while rows % tm:
        tm -= 8
    tn = min(Vp, 512)
    while Vp % tn:
        tn -= 128

    dec_bytes = tm * Hp * 2 + Hp * tn * 2 + tn * 4 + tm * tn * 4

    logits = pl.pallas_call(
        _decoder_kernel,
        out_shape=jax.ShapeDtypeStruct((rows, Vp), jnp.float32),
        grid_spec=pltpu.PrefetchScalarGridSpec(
            num_scalar_prefetch=0,
            grid=(rows // tm, Vp // tn),
            in_specs=[
                pl.BlockSpec((tm, Hp), lambda i, j: (i, 0)),     # activations
                pl.BlockSpec((Hp, tn), lambda i, j: (0, j)),     # W_dec^T tile
                pl.BlockSpec((1, tn), lambda i, j: (0, j)),      # b_dec tile
            ],
            out_specs=pl.BlockSpec((tm, tn), lambda i, j: (i, j))),
        compiler_params=pltpu.CompilerParams(
            dimension_semantics=("parallel", "parallel"),        # v7x: 2 TCs
            vmem_limit_bytes=_vmem_limit(dec_bytes)),
    )(act, prep["w_dec_p"], prep["b_dec_p"])

    out = logits.reshape(T, Bp, Vp)                # metadata-only reshape
    h_out = hT[:, :B, :H]
    c_out = cT[:, :B, :H]
    if slice_output:
        # NOTE: at realistic vocab sizes keep the padded (T, Bp, Vp) slab and
        # slice lazily at the consumer — this slice copies the full logits.
        out = out[:, :B, :V]
    return out, (h_out, c_out)


# ----------------------------------------------------------------------------
# Pure-JAX reference (f32 everywhere, unpadded params) for a sanity check
# ----------------------------------------------------------------------------
def rnn_reference(params, x_ids, h):
    h0, c0 = h
    x = jnp.take(params["emb"], x_ids, axis=0)
    hs, cs = [], []
    for l in range(params["num_layers"]):
        w_ih_t, w_hh_t, b = params["w_ih_t"][l], params["w_hh_t"][l], params["b"][l]

        def step(carry, x_t):
            hprev, cprev = carry
            gates = x_t @ w_ih_t + hprev @ w_hh_t + b
            i, f, g, o = jnp.split(gates, 4, axis=-1)
            c_new = jax.nn.sigmoid(f) * cprev + jax.nn.sigmoid(i) * jnp.tanh(g)
            h_new = jax.nn.sigmoid(o) * jnp.tanh(c_new)
            return (h_new, c_new), h_new

        (hT, cT), x = jax.lax.scan(step, (h0[l], c0[l]), x)
        hs.append(hT)
        cs.append(cT)
    out = x @ params["w_dec_t"] + params["b_dec"]
    return out, (jnp.stack(hs), jnp.stack(cs))


if __name__ == "__main__":
    num_layers = 2
    hidden_size = 32
    input_size = 64   # vocab size
    seq_len = 8
    batch = 4

    key = jax.random.PRNGKey(0)
    kp, kx = jax.random.split(key)
    params = init_params(kp, num_layers, hidden_size, input_size)
    prep = prepare_params(params)     # one-time: pad to lane tiles + bf16 cast

    x_ids = jax.random.randint(kx, (seq_len, batch), 0, input_size, dtype=jnp.int32)
    h0 = jnp.zeros((num_layers, batch, hidden_size), jnp.float32)
    c0 = jnp.zeros((num_layers, batch, hidden_size), jnp.float32)

    out, (h_out, c_out) = rnn_forward(prep, x_ids, (h0, c0))
    jax.block_until_ready((out, h_out, c_out))

    ref_out, (ref_h, ref_c) = rnn_reference(params, x_ids, (h0, c0))
    # bf16 matmul operands (f32 accumulation) vs f32 reference -> loosened tol.
    assert jnp.allclose(out, ref_out, atol=2e-2, rtol=2e-2)
    assert jnp.allclose(h_out, ref_h, atol=2e-2, rtol=2e-2)
    assert jnp.allclose(c_out, ref_c, atol=2e-2, rtol=2e-2)

    print("KERNEL_OK")
</pallas_src>

<mosaic_0001>
module attributes {stable_mosaic.version = 11 : i64} {
  func.func @_lstm_stack_kernel(%arg0: i32, %arg1: memref<64x128xbf16, #tpu.memory_space<vmem>>, %arg2: memref<1x8x128xf32, #tpu.memory_space<vmem>>, %arg3: memref<1x8x128xf32, #tpu.memory_space<vmem>>, %arg4: memref<1x128x512xbf16, #tpu.memory_space<vmem>>, %arg5: memref<1x128x512xbf16, #tpu.memory_space<vmem>>, %arg6: memref<1x1x512xf32, #tpu.memory_space<vmem>>, %arg7: memref<64x128xbf16, #tpu.memory_space<vmem>>, %arg8: memref<1x8x128xf32, #tpu.memory_space<vmem>>, %arg9: memref<1x8x128xf32, #tpu.memory_space<vmem>>, %arg10: memref<64x512xf32, #tpu.memory_space<vmem>>, %arg11: memref<8x128xf32, #tpu.memory_space<vmem>>, %arg12: memref<8x128xf32, #tpu.memory_space<vmem>>) attributes {dimension_semantics = [#tpu.dimension_semantics<arbitrary>], iteration_bounds = array<i64: 2>, scalar_prefetch = 0 : i64, scratch_operands = 3 : i64, tpu.core_type = #tpu.core_type<tc>, window_params = [{pipeline_mode = #tpu.pipeline_mode<synchronous>, transform_indices = @transform_0, window_bounds = array<i64: 64, 128>}, {transform_indices = @transform_1, window_bounds = array<i64: 1, 8, 128>}, {transform_indices = @transform_2, window_bounds = array<i64: 1, 8, 128>}, {transform_indices = @transform_3, window_bounds = array<i64: 1, 128, 512>}, {transform_indices = @transform_4, window_bounds = array<i64: 1, 128, 512>}, {transform_indices = @transform_5, window_bounds = array<i64: 1, 1, 512>}, {pipeline_mode = #tpu.pipeline_mode<synchronous>, transform_indices = @transform_6, window_bounds = array<i64: 64, 128>}, {transform_indices = @transform_7, window_bounds = array<i64: 1, 8, 128>}, {transform_indices = @transform_8, window_bounds = array<i64: 1, 8, 128>}]} {
    %c0_i32 = arith.constant 0 : i32
    %0 = arith.cmpi eq, %arg0, %c0_i32 : i32
    %1 = arith.extui %0 : i1 to i32
    %c0_i32_0 = arith.constant 0 : i32
    %2 = arith.cmpi ne, %1, %c0_i32_0 : i32
    scf.if %2 {
      %c0_35 = arith.constant 0 : index
      %c0_36 = arith.constant 0 : index
      %29 = vector.load %arg1[%c0_35, %c0_36] : memref<64x128xbf16, #tpu.memory_space<vmem>>, vector<64x128xbf16>
      %c0_37 = arith.constant 0 : index
      %c0_38 = arith.constant 0 : index
      %30 = vector.load %arg7[%c0_37, %c0_38] : memref<64x128xbf16, #tpu.memory_space<vmem>>, vector<64x128xbf16>
      tpu.vector_store %arg7[%c0_37, %c0_38], %29 {strides = array<i32>} : memref<64x128xbf16, #tpu.memory_space<vmem>>, vector<64x128xbf16>,
    } else {
    }
    %c0 = arith.constant 0 : index
    %c0_1 = arith.constant 0 : index
    %3 = vector.load %arg7[%c0, %c0_1] : memref<64x128xbf16, #tpu.memory_space<vmem>>, vector<64x128xbf16>
    %c0_2 = arith.constant 0 : index
    %c0_3 = arith.constant 0 : index
    %c0_4 = arith.constant 0 : index
    %4 = vector.load %arg4[%c0_2, %c0_3, %c0_4] : memref<1x128x512xbf16, #tpu.memory_space<vmem>>, vector<1x128x512xbf16>
    %5 = vector.shape_cast %4 : vector<1x128x512xbf16> to vector<128x512xbf16>
    %cst = arith.constant dense<0.000000e+00> : vector<64x512xf32>
    %6 = tpu.matmul %3, %5, %cst {dimension_numbers = #tpu.dot_dimension_numbers<[1], [0], [0], [1], [0, 0, 1, 1], [], []>} : vector<64x128xbf16>, vector<128x512xbf16>, vector<64x512xf32> -> vector<64x512xf32>
    %c0_5 = arith.constant 0 : index
    %c0_6 = arith.constant 0 : index
    %c0_7 = arith.constant 0 : index
    %7 = vector.load %arg6[%c0_5, %c0_6, %c0_7] : memref<1x1x512xf32, #tpu.memory_space<vmem>>, vector<1x1x512xf32>
    %8 = vector.shape_cast %7 : vector<1x1x512xf32> to vector<1x512xf32>
    %9 = vector.broadcast %8 : vector<1x512xf32> to vector<64x512xf32>
    %10 = arith.addf %6, %9 : vector<64x512xf32>
    %c0_8 = arith.constant 0 : index
    %c0_9 = arith.constant 0 : index
    %11 = vector.load %arg10[%c0_8, %c0_9] : memref<64x512xf32, #tpu.memory_space<vmem>>, vector<64x512xf32>
    tpu.vector_store %arg10[%c0_8, %c0_9], %10 {strides = array<i32>} : memref<64x512xf32, #tpu.memory_space<vmem>>, vector<64x512xf32>,
    %c0_10 = arith.constant 0 : index
    %c0_11 = arith.constant 0 : index
    %c0_12 = arith.constant 0 : index
    %12 = vector.load %arg2[%c0_10, %c0_11, %c0_12] : memref<1x8x128xf32, #tpu.memory_space<vmem>>, vector<1x8x128xf32>
    %13 = vector.shape_cast %12 : vector<1x8x128xf32> to vector<8x128xf32>
    %c0_13 = arith.constant 0 : index
    %c0_14 = arith.constant 0 : index
    %14 = vector.load %arg11[%c0_13, %c0_14] : memref<8x128xf32, #tpu.memory_space<vmem>>, vector<8x128xf32>
    tpu.vector_store %arg11[%c0_13, %c0_14], %13 {strides = array<i32>} : memref<8x128xf32, #tpu.memory_space<vmem>>, vector<8x128xf32>,
    %c0_15 = arith.constant 0 : index
    %c0_16 = arith.constant 0 : index
    %c0_17 = arith.constant 0 : index
    %15 = vector.load %arg3[%c0_15, %c0_16, %c0_17] : memref<1x8x128xf32, #tpu.memory_space<vmem>>, vector<1x8x128xf32>
    %16 = vector.shape_cast %15 : vector<1x8x128xf32> to vector<8x128xf32>
    %c0_18 = arith.constant 0 : index
    %c0_19 = arith.constant 0 : index
    %17 = vector.load %arg12[%c0_18, %c0_19] : memref<8x128xf32, #tpu.memory_space<vmem>>, vector<8x128xf32>
    tpu.vector_store %arg12[%c0_18, %c0_19], %16 {strides = array<i32>} : memref<8x128xf32, #tpu.memory_space<vmem>>, vector<8x128xf32>,
    %c0_20 = arith.constant 0 : index
    %c0_21 = arith.constant 0 : index
    %c0_22 = arith.constant 0 : index
    %18 = vector.load %arg5[%c0_20, %c0_21, %c0_22] : memref<1x128x512xbf16, #tpu.memory_space<vmem>>, vector<1x128x512xbf16>
    %19 = vector.shape_cast %18 : vector<1x128x512xbf16> to vector<128x512xbf16>
    %c0_i32_23 = arith.constant 0 : i32
    %c8_i32 = arith.constant 8 : i32
    %20 = arith.addi %c0_i32_23, %c8_i32 : i32
    %c1_i32 = arith.constant 1 : i32
    scf.for %arg13 = %c0_i32_23 to %20 step %c1_i32  : i32 {
      %c8_i32_35 = arith.constant 8 : i32
      %29 = arith.muli %arg13, %c8_i32_35 : i32
      %30 = tpu.assume_multiple %29, 8 : i32
      %c0_36 = arith.constant 0 : index
      %c0_37 = arith.constant 0 : index
      %31 = vector.load %arg11[%c0_36, %c0_37] : memref<8x128xf32, #tpu.memory_space<vmem>>, vector<8x128xf32>
      %c0_38 = arith.constant 0 : index
      %c0_39 = arith.constant 0 : index
      %32 = vector.load %arg12[%c0_38, %c0_39] : memref<8x128xf32, #tpu.memory_space<vmem>>, vector<8x128xf32>
      %33 = arith.index_cast %30 : i32 to index
      %c0_40 = arith.constant 0 : index
      %34 = vector.load %arg10[%33, %c0_40] : memref<64x512xf32, #tpu.memory_space<vmem>>, vector<8x512xf32>
      %35 = arith.truncf %31 : vector<8x128xf32> to vector<8x128xbf16>
      %cst_41 = arith.constant dense<0.000000e+00> : vector<8x512xf32>
      %36 = tpu.matmul %35, %19, %cst_41 {dimension_numbers = #tpu.dot_dimension_numbers<[1], [0], [0], [1], [0, 0, 1, 1], [], []>} : vector<8x128xbf16>, vector<128x512xbf16>, vector<8x512xf32> -> vector<8x512xf32>
      %37 = arith.addf %34, %36 : vector<8x512xf32>
      %38 = vector.extract_strided_slice %37 {offsets = [0, 0], sizes = [8, 128], strides = [1, 1]} : vector<8x512xf32> to vector<8x128xf32>
      %39 = arith.negf %38 : vector<8x128xf32>
      %40 = math.exp %39 : vector<8x128xf32>
      %cst_42 = arith.constant 1.000000e+00 : f32
      %41 = vector.broadcast %cst_42 : f32 to vector<8x128xf32>
      %42 = arith.addf %41, %40 : vector<8x128xf32>
      %43 = arith.divf %41, %42 : vector<8x128xf32>
      %44 = vector.extract_strided_slice %37 {offsets = [0, 128], sizes = [8, 128], strides = [1, 1]} : vector<8x512xf32> to vector<8x128xf32>
      %45 = arith.negf %44 : vector<8x128xf32>
      %46 = math.exp %45 : vector<8x128xf32>
      %cst_43 = arith.constant 1.000000e+00 : f32
      %47 = vector.broadcast %cst_43 : f32 to vector<8x128xf32>
      %48 = arith.addf %47, %46 : vector<8x128xf32>
      %49 = arith.divf %47, %48 : vector<8x128xf32>
      %50 = vector.extract_strided_slice %37 {offsets = [0, 256], sizes = [8, 128], strides = [1, 1]} : vector<8x512xf32> to vector<8x128xf32>
      %51 = math.tanh %50 : vector<8x128xf32>
      %52 = vector.extract_strided_slice %37 {offsets = [0, 384], sizes = [8, 128], strides = [1, 1]} : vector<8x512xf32> to vector<8x128xf32>
      %53 = arith.negf %52 : vector<8x128xf32>
      %54 = math.exp %53 : vector<8x128xf32>
      %cst_44 = arith.constant 1.000000e+00 : f32
      %55 = vector.broadcast %cst_44 : f32 to vector<8x128xf32>
      %56 = arith.addf %55, %54 : vector<8x128xf32>
      %57 = arith.divf %55, %56 : vector<8x128xf32>
      %58 = arith.mulf %49, %32 : vector<8x128xf32>
      %59 = arith.mulf %43, %51 : vector<8x128xf32>
      %60 = arith.addf %58, %59 : vector<8x128xf32>
      %61 = math.tanh %60 : vector<8x128xf32>
      %62 = arith.mulf %57, %61 : vector<8x128xf32>
      %c0_45 = arith.constant 0 : index
      %c0_46 = arith.constant 0 : index
      %63 = vector.load %arg11[%c0_45, %c0_46] : memref<8x128xf32, #tpu.memory_space<vmem>>, vector<8x128xf32>
      tpu.vector_store %arg11[%c0_45, %c0_46], %62 {strides = array<i32>} : memref<8x128xf32, #tpu.memory_space<vmem>>, vector<8x128xf32>,
      %c0_47 = arith.constant 0 : index
      %c0_48 = arith.constant 0 : index
      %64 = vector.load %arg12[%c0_47, %c0_48] : memref<8x128xf32, #tpu.memory_space<vmem>>, vector<8x128xf32>
      tpu.vector_store %arg12[%c0_47, %c0_48], %60 {strides = array<i32>} : memref<8x128xf32, #tpu.memory_space<vmem>>, vector<8x128xf32>,
      %65 = arith.truncf %62 : vector<8x128xf32> to vector<8x128xbf16>
      %66 = arith.index_cast %30 : i32 to index
      %c0_49 = arith.constant 0 : index
      %67 = vector.load %arg7[%66, %c0_49] : memref<64x128xbf16, #tpu.memory_space<vmem>>, vector<8x128xbf16>
      tpu.vector_store %arg7[%66, %c0_49], %65 {strides = array<i32>} : memref<64x128xbf16, #tpu.memory_space<vmem>>, vector<8x128xbf16>,
    }
    %c8_i32_24 = arith.constant 8 : i32
    %c0_25 = arith.constant 0 : index
    %c0_26 = arith.constant 0 : index
    %21 = vector.load %arg11[%c0_25, %c0_26] : memref<8x128xf32, #tpu.memory_space<vmem>>, vector<8x128xf32>
    %c0_27 = arith.constant 0 : index
    %c0_28 = arith.constant 0 : index
    %c0_29 = arith.constant 0 : index
    %22 = vector.load %arg8[%c0_27, %c0_28, %c0_29] : memref<1x8x128xf32, #tpu.memory_space<vmem>>, vector<1x8x128xf32>
    %23 = vector.shape_cast %22 : vector<1x8x128xf32> to vector<8x128xf32>
    %24 = vector.shape_cast %21 : vector<8x128xf32> to vector<1x8x128xf32>
    tpu.vector_store %arg8[%c0_27, %c0_28, %c0_29], %24 {strides = array<i32>} : memref<1x8x128xf32, #tpu.memory_space<vmem>>, vector<1x8x128xf32>,
    %c0_30 = arith.constant 0 : index
    %c0_31 = arith.constant 0 : index
    %25 = vector.load %arg12[%c0_30, %c0_31] : memref<8x128xf32, #tpu.memory_space<vmem>>, vector<8x128xf32>
    %c0_32 = arith.constant 0 : index
    %c0_33 = arith.constant 0 : index
    %c0_34 = arith.constant 0 : index
    %26 = vector.load %arg9[%c0_32, %c0_33, %c0_34] : memref<1x8x128xf32, #tpu.memory_space<vmem>>, vector<1x8x128xf32>
    %27 = vector.shape_cast %26 : vector<1x8x128xf32> to vector<8x128xf32>
    %28 = vector.shape_cast %25 : vector<8x128xf32> to vector<1x8x128xf32>
    tpu.vector_store %arg9[%c0_32, %c0_33, %c0_34], %28 {strides = array<i32>} : memref<1x8x128xf32, #tpu.memory_space<vmem>>, vector<1x8x128xf32>,
    return
  }
  func.func @transform_0(%arg0: i32) -> (i32, i32) {
    %c0_i32 = arith.constant 0 : i32
    %c0_i32_0 = arith.constant 0 : i32
    %c0_i32_1 = arith.constant 0 : i32
    return %c0_i32, %c0_i32_0 : i32, i32
  }
  func.func @transform_1(%arg0: i32) -> (i32, i32, i32) {
    %c0_i32 = arith.constant 0 : i32
    %c0_i32_0 = arith.constant 0 : i32
    %c0_i32_1 = arith.constant 0 : i32
    return %arg0, %c0_i32, %c0_i32_0 : i32, i32, i32
  }
  func.func @transform_2(%arg0: i32) -> (i32, i32, i32) {
    %c0_i32 = arith.constant 0 : i32
    %c0_i32_0 = arith.constant 0 : i32
    %c0_i32_1 = arith.constant 0 : i32
    return %arg0, %c0_i32, %c0_i32_0 : i32, i32, i32
  }
  func.func @transform_3(%arg0: i32) -> (i32, i32, i32) {
    %c0_i32 = arith.constant 0 : i32
    %c0_i32_0 = arith.constant 0 : i32
    %c0_i32_1 = arith.constant 0 : i32
    return %arg0, %c0_i32, %c0_i32_0 : i32, i32, i32
  }
  func.func @transform_4(%arg0: i32) -> (i32, i32, i32) {
    %c0_i32 = arith.constant 0 : i32
    %c0_i32_0 = arith.constant 0 : i32
    %c0_i32_1 = arith.constant 0 : i32
    return %arg0, %c0_i32, %c0_i32_0 : i32, i32, i32
  }
  func.func @transform_5(%arg0: i32) -> (i32, i32, i32) {
    %c0_i32 = arith.constant 0 : i32
    %c0_i32_0 = arith.constant 0 : i32
    %c0_i32_1 = arith.constant 0 : i32
    return %arg0, %c0_i32, %c0_i32_0 : i32, i32, i32
  }
  func.func @transform_6(%arg0: i32) -> (i32, i32) {
    %c0_i32 = arith.constant 0 : i32
    %c0_i32_0 = arith.constant 0 : i32
    %c0_i32_1 = arith.constant 0 : i32
    return %c0_i32, %c0_i32_0 : i32, i32
  }
  func.func @transform_7(%arg0: i32) -> (i32, i32, i32) {
    %c0_i32 = arith.constant 0 : i32
    %c0_i32_0 = arith.constant 0 : i32
    %c0_i32_1 = arith.constant 0 : i32
    return %arg0, %c0_i32, %c0_i32_0 : i32, i32, i32
  }
  func.func @transform_8(%arg0: i32) -> (i32, i32, i32) {
    %c0_i32 = arith.constant 0 : i32
    %c0_i32_0 = arith.constant 0 : i32
    %c0_i32_1 = arith.constant 0 : i32
    return %arg0, %c0_i32, %c0_i32_0 : i32, i32, i32
  }
}

</mosaic_0001>

<bundles_post_ra>
// kernel: tpu_custom_call.1
= control target key start
LH: loop header
LB: loop body
LE: loop exit
PB: predicated region body
PF: predicated region fallthrough
CT: control target
= control target key end

     0   :  { %s2795_s0 = inlined_call_operand.hbm [shape: bf16[64,128], index: 0, kind: input, shape index: {}]   ;;  %s2796_s1 = inlined_call_operand.hbm [shape: f32[2,8,128], index: 1, kind: input, shape index: {}]   ;;  %s2797_s2 = inlined_call_operand.hbm [shape: f32[2,8,128], index: 2, kind: input, shape index: {}]   ;;  %s2798_s3 = inlined_call_operand.hbm [shape: bf16[2,128,512], index: 3, kind: input, shape index: {}]   ;;  %s2799_s4 = inlined_call_operand.hbm [shape: bf16[2,128,512], index: 4, kind: input, shape index: {}]   ;;  %s2800_s5 = inlined_call_operand.vmem [shape: f32[2,1,512], index: 5, kind: input, shape index: {}]   ;;  %s2801_s6 = inlined_call_operand.hbm [shape: bf16[64,128], index: 6, kind: output, shape index: {0}]   ;;  %s2802_s7 = inlined_call_operand.hbm [shape: f32[2,8,128], index: 7, kind: output, shape index: {1}]   ;;  %s2803_s8 = inlined_call_operand.hbm [shape: f32[2,8,128], index: 8, kind: output, shape index: {2}]  }
   0x1   :  { %2824 = sst [smem:[#allocation27_spill]] %s2796_s1 }
   0x2   :  { %2825 = sst [smem:[#allocation28_spill]] %s2798_s3 }
   0x3   :  { %2826 = sst [smem:[#allocation29_spill]] %s2801_s6 }
   0x4   :  { %14 = vsyncpa [#allocation6], 0 }
   0x5   :  { %15 = vsyncpa [#allocation9], 0 }
   0x6   :  { %17 = vsyncpa [#allocation9 + $0x1], 0 }
   0x7   :  { %18 = vsyncpa [#allocation12], 0 }
   0x8   :  { %20 = vsyncpa [#allocation12 + $0x1], 0 }
   0x9   :  { %21 = vsyncpa [#allocation7], 0 }
   0xa   :  { %22 = vsyncpa [#allocation16], 0 }
   0xb   :  { %24 = vsyncpa [#allocation16 + $0x1], 0  ;;  %s2132_s27 = smov 0   ;;  %s2134_s28 = smov 0  }
   0xc   :  { %s2136_s29 = smov 0   ;;  %s2138_s30 = smov 0  }
   0xd LB: > { %2827 = sst [smem:[#allocation23_spill]] %s2061_s29  ;;  %s2153_s9 = sadd.s32 1, %s2065_s30   ;;  %s2065_s30 = sphi %s2138_s30, %s2863_s30   ;;  %s2061_s29 = sphi %s2136_s29, %s2865_s29   ;;  %s2057_s28 = sphi %s2134_s28, %s2867_s28   ;;  %s2053_s27 = sphi %s2132_s27, %s2866_s27  }
   0xe   : > { %2828 = sst [smem:[#allocation24_spill]] %s2153_s9  ;;  %s58_s10 = sadd.s32 1, %s2061_s29 }
   0xf   : > { %s55_s11 = ssub.s32 %s2065_s30, %s2153_s9  ;;  %p2804_p0 = scmp.ne.s32.totalorder %s2061_s29, %s2057_s28 }
  0x10   : > { %p56_p1 = scmp.eq.s32.totalorder %s55_s11, 0  ;;  %p66_p2 = scmp.eq.s32.totalorder %s2065_s30, 0 }
  0x11   : > { %p1658_p4 = scmp.lt.s32.totalorder %s2065_s30, 2  ;;  %s2805_s13 = sand.u32 1, %s2065_s30  }
  0x12   : > { %s2164_s12 = scalar_select %p56_p1, %s2061_s29, %s58_s10  }
  0x13   : > { %p67_p5 = por %p66_p2, %p2804_p0  ;;  %s287_s14 = sand.u32 1, %s2061_s29  }
  0x14   : > { %2829 = sst [smem:[#allocation25_spill]] %s2164_s12  ;;  %s2173_s15 = sshll.u32 %s287_s14, 3 }
  0x15   : > { %s1508_s16 = sshll.u32 %s2065_s30, 7  ;;  %s2830_s1 = sld [smem:[#allocation27_spill]] }
  0x16   : > { %s289_s20 = scalar_lea.vmem [#allocation8], %s2173_s15  ;;  %p2184_p6 = pnand %p1658_p4, %p67_p5 }
  0x17   : > { %s296_s21 = sshll.u32 %s289_s20, 4  ;;  %s2192_s23 = scalar_lea.sflag [#allocation9], %s2805_s13  ;;  %s2188_s21 = int_to_ptr.vmem [resolvable:$true] %s296_s21 }
  0x18   : > { %s2831_s22 = scalar_select %p2184_p6, 1, 0 }
  0x19   : > { %p2198_p8 = pneg %p2184_p6 }
  0x1b   : > { %s2181_s19 = scalar_lea.hbm %s2830_s1, %s1508_s16  ;;  %s1786_s11 = scalar_lea.hbm %s2830_s1, 256 }
  0x1c   : > { %s1781_s24 = scalar_lea.hbm %s2181_s19, 128  ;;  %p1787_p11 = scmp.lt.u32.totalorder %s2181_s19, %s2830_s1 }
  0x1d   : > { %p1782_p7 = scmp.ne.s32.totalorder %s2181_s19, %s1781_s24  ;;  %p1788_p12 = scmp.lt.u32.totalorder %s1786_s11, %s1781_s24 }
  0x1e   : > { %s2832_s25 = scalar_select %p2198_p8, 1, 0 }
  0x1f   : > { %p1784_p9 = pnand %p2198_p8, %p1782_p7  ;;  %p1789_p13 = por %p1788_p12, %p1787_p11 }
  0x20   : > { %p1790_p1 = scmp.lt.u32.totalorder %s1781_s24, %s2181_s19 }
  0x21   : > { %p1785_p10 = pneg %p1784_p9 }
  0x22   : > { %p1791_p2 = por %p1790_p1, %p1789_p13 }
  0x24   : > { %p1792_p4 = pnand %p1791_p2, %p1785_p10 }
  0x26   : > { %1795 = shalt.err (!%p1792_p4)
}
  0x27   : > { %s1796_s20 = scalar_lea.vmem %s2188_s21, 128  ;;  %s2071_s26 = smov [#allocation8]  }
  0x28   : > { %p1797_p5 = scmp.ne.s32.totalorder %s2188_s21, %s1796_s20  ;;  %s1801_s10 = sshll.u32 %s2071_s26, 4  ;;  %s1802_s10 = int_to_ptr.vmem [resolvable:$false] %s1801_s10 }
  0x29   : > { %s1803_s17 = scalar_lea.vmem %s1802_s10, 256  ;;  %p1804_p3 = scmp.lt.s32.totalorder %s2188_s21, %s1802_s10 }
  0x2a   : > { %p1799_p7 = pnand %p1797_p5, %p2198_p8  ;;  %p1805_p0 = scmp.lt.s32.totalorder %s1803_s17, %s1796_s20 }
  0x2c   : > { %p1800_p9 = pneg %p1799_p7  ;;  %p1806_p11 = por %p1805_p0, %p1804_p3 }
  0x2e   : > { %p1807_p12 = pnand %p1806_p11, %p1800_p9 }
  0x30   : > { %1810 = shalt.err (!%p1807_p12)
}
  0x31   : > { %1640 = dma.hbm_to_vmem [thread:$0]  (!%p2184_p6), %s2181_s19, 128, %s2188_s21, %s2192_s23  }
  0x32   : > { %s2227_s18 = scalar_lea.hbm %s2797_s2, %s1508_s16  ;;  %s1511_s20 = sshll.u32 %s287_s14, 8 }
  0x33   : > { %s325_s26 = scalar_lea.vmem [#allocation11], %s1511_s20  ;;  %s346_s17 = scalar_lea.vmem [#allocation13], %s1511_s20 }
  0x34   : > { %s332_s10 = sshll.u32 %s325_s26, 4  ;;  %s2231_s13 = sshll.u32 %s346_s17, 4  ;;  %s2241_s10 = int_to_ptr.vmem [resolvable:$true] %s332_s10  ;;  %s2273_s13 = int_to_ptr.vmem [resolvable:$true] %s2231_s13 }
  0x35   : > { %s1610_s1 = sshll.u32 %s2065_s30, 12  ;;  %s2833_s3 = sld [smem:[#allocation28_spill]] }
  0x36   : > { %s2834_s16 = sand.u32 1, %s2065_s30  }
  0x37   : > { %s2245_s14 = scalar_lea.sflag [#allocation12], %s2834_s16 }
  0x3b   : > { %s2239_s6 = scalar_lea.hbm %s2833_s3, %s1610_s1  ;;  %s1816_s9 = scalar_lea.hbm %s2833_s3, 8192 }
  0x3c   : > { %s1811_s19 = scalar_lea.hbm %s2239_s6, 4096  ;;  %p1817_p13 = scmp.lt.u32.totalorder %s2239_s6, %s2833_s3 }
  0x3d   : > { %p1812_p0 = scmp.ne.s32.totalorder %s2239_s6, %s1811_s19  ;;  %p1818_p1 = scmp.lt.u32.totalorder %s1816_s9, %s1811_s19 }
  0x3e   : > { %p1820_p4 = scmp.lt.u32.totalorder %s1811_s19, %s2239_s6 }
  0x3f   : > { %p1814_p3 = pnand %p1812_p0, %p2198_p8  ;;  %p1819_p2 = por %p1818_p1, %p1817_p13 }
  0x41   : > { %p1815_p10 = pneg %p1814_p3  ;;  %p1821_p5 = por %p1820_p4, %p1819_p2 }
  0x43   : > { %p1822_p7 = pnand %p1821_p5, %p1815_p10 }
  0x45   : > { %1825 = shalt.err (!%p1822_p7)
}
  0x46   : > { %s1826_s20 = scalar_lea.vmem %s2241_s10, 4096  ;;  %s2072_s26 = smov [#allocation11]  }
  0x47   : > { %p1827_p9 = scmp.ne.s32.totalorder %s2241_s10, %s1826_s20  ;;  %s1831_s17 = sshll.u32 %s2072_s26, 4  ;;  %s1832_s17 = int_to_ptr.vmem [resolvable:$false] %s1831_s17 }
  0x48   : > { %s1833_s16 = scalar_lea.vmem %s1832_s17, 8192  ;;  %p1834_p0 = scmp.lt.s32.totalorder %s2241_s10, %s1832_s17 }
  0x49   : > { %p1829_p11 = pnand %p1827_p9, %p2198_p8  ;;  %p1835_p3 = scmp.lt.s32.totalorder %s1833_s16, %s1826_s20 }
  0x4b   : > { %p1830_p12 = pneg %p1829_p11  ;;  %p1836_p13 = por %p1835_p3, %p1834_p0 }
  0x4d   : > { %p1837_p1 = pnand %p1836_p13, %p1830_p12 }
  0x4f   : > { %1840 = shalt.err (!%p1837_p1)
}
  0x50   : > { %s2810_s19 = smov 256   ;;  %s2811_s21 = smov 16  }
  0x51   : > { %1646 = dma.hbm_to_vmem [thread:$0]  (!%p2184_p6), %s2239_s6, 4096, %s2241_s10, %s2245_s14, %s2810_s19, %s2810_s19, %s2811_s21  }
  0x52   : > { %s2276_s24 = sadd.s32 4294967295, %s2065_s30   ;;  %s2809_s9 = sadd.s32 4294967294, %s2065_s30  }
  0x53   : > { %p71_p10 = scmp.ne.s32.totalorder %s2057_s28, %s2053_s27  ;;  %p2814_p2 = scmp.eq.s32.totalorder %s2276_s24, 0 }
  0x54   : > { %p2813_p4 = scmp.eq.s32.totalorder %s2276_s24, 1  ;;  %p226_p5 = scmp.eq.s32.totalorder %s2809_s9, 1 }
  0x55   : > { %p1504_p7 = scmp.ge.s32.totalorder %s2065_s30, 1  ;;  %p2288_p9 = por %p2814_p2, %p71_p10 }
  0x56   : > { %p2836_p11 = scmp.ne.s32.totalorder %s2061_s29, %s2057_s28  ;;  %p2301_p0 = por %p226_p5, %p71_p10 }
  0x57   : > { %s2835_s6 = scalar_select %p2288_p9, 1, 0 }
  0x58   : > { %p2297_p12 = por %p2813_p4, %p2836_p11  ;;  %p259_p3 = scmp.lt.s32.totalorder %s2065_s30, 3 }
  0x59   : > { %s2838_s27 = scalar_select %p2301_p0, 1, 0 }
  0x5a   : > { %s2837_s10 = scalar_select %p2297_p12, 1, 0 }
  0x5b   : > { %2839 = sst [smem:[#allocation26_spill]] %s2838_s27  ;;  %p2307_p1 = pnand %p1504_p7, %p259_p3 }
  0x5c   : > { %s2075_s11 = smov [#allocation5]   ;;  %s2316_s16 = scalar_lea.hbm %s2799_s4, %s1610_s1 }
  0x5d   : > { %s2840_s12 = scalar_select %p2307_p1, 1, 0 }
  0x5e   : > { %s271_s20 = sshll.u32 %s2075_s11, 4  ;;  %p1633_p10 = pneg %p2307_p1  ;;  %s2318_s20 = int_to_ptr.vmem [resolvable:$true] %s271_s20 }
  0x5f   : > { %s307_s9 = scalar_lea.vmem [#allocation10], %s2173_s15  ;;  %s1841_s11 = scalar_lea.hbm %s2227_s18, 128 }
  0x60   : > { %s314_s19 = sshll.u32 %s307_s9, 4  ;;  %p2325_p5 = pnand %p1633_p10, %p2814_p2  ;;  %s315_s19 = int_to_ptr.vmem [resolvable:$true] %s314_s19 }
  0x61   : > { %p1842_p7 = scmp.ne.s32.totalorder %s2227_s18, %s1841_s11  ;;  %s1846_s17 = scalar_lea.hbm %s2797_s2, 256 }
  0x62   : > { %s2841_s21 = scalar_select %p2325_p5, 1, 0 }
  0x63   : > { %p1844_p11 = pnand %p1842_p7, %p2198_p8  ;;  %p1847_p4 = scmp.lt.u32.totalorder %s2227_s18, %s2797_s2 }
  0x64   : > { %p1848_p13 = scmp.lt.u32.totalorder %s1846_s17, %s1841_s11  ;;  %p1850_p10 = scmp.lt.u32.totalorder %s1841_s11, %s2227_s18 }
  0x65   : > { %p1845_p3 = pneg %p1844_p11 }
  0x66   : > { %p1849_p0 = por %p1848_p13, %p1847_p4 }
  0x68   : > { %p1851_p2 = por %p1850_p10, %p1849_p0 }
  0x6a   : > { %p1852_p12 = pnand %p1851_p2, %p1845_p3 }
  0x6c   : > { %1855 = shalt.err (!%p1852_p12)
}
  0x6d   : > { %s1856_s15 = scalar_lea.vmem %s315_s19, 128  ;;  %s2076_s9 = smov [#allocation10]  }
  0x6e   : > { %p1857_p9 = scmp.ne.s32.totalorder %s315_s19, %s1856_s15  ;;  %s1861_s27 = sshll.u32 %s2076_s9, 4  ;;  %s1862_s27 = int_to_ptr.vmem [resolvable:$false] %s1861_s27 }
  0x6f   : > { %s1863_s26 = scalar_lea.vmem %s1862_s27, 256  ;;  %p1864_p1 = scmp.lt.s32.totalorder %s315_s19, %s1862_s27 }
  0x70   : > { %p1859_p7 = pnand %p1857_p9, %p2198_p8  ;;  %p1865_p5 = scmp.lt.s32.totalorder %s1863_s26, %s1856_s15 }
  0x72   : > { %p1860_p11 = pneg %p1859_p7  ;;  %p1866_p6 = por %p1865_p5, %p1864_p1 }
  0x74   : > { %p1867_p4 = pnand %p1866_p6, %p1860_p11 }
  0x76   : > { %1870 = shalt.err (!%p1867_p4)
}
  0x77   : > { %p2842_p13 = scmp.ne.s32.totalorder %s2831_s22, 0  ;;  %s1871_s11 = scalar_lea.hbm %s2795_s0, 512 }
  0x78   : > { %p1872_p2 = scmp.ne.s32.totalorder %s2795_s0, %s1871_s11  ;;  %p2843_p9 = scmp.ne.s32.totalorder %s2841_s21, 0 }
  0x79   : > { %1643 = dma.hbm_to_vmem [thread:$0]  (!%p2842_p13), %s2227_s18, 128, %s315_s19, %s2192_s23  }
  0x7a   : > { %p1873_p12 = pneg %p2843_p9  ;;  %p1878_p6 = scmp.lt.u32.totalorder %s1871_s11, %s2795_s0 }
  0x7c   : > { %p1874_p0 = pnand %p1873_p12, %p1872_p2 }
  0x7e   : > { %p1875_p1 = pneg %p1874_p0 }
  0x80   : > { %p1880_p5 = pnand %p1878_p6, %p1875_p1 }
  0x82   : > { %1883 = shalt.err (!%p1880_p5)
}
  0x83   : > { %s1884_s23 = scalar_lea.vmem %s2318_s20, 512  ;;  %p1892_p11 = scmp.lt.s32.totalorder %s2318_s20, %s2318_s20 }
  0x84   : > { %p1885_p3 = scmp.ne.s32.totalorder %s2318_s20, %s1884_s23  ;;  %p1893_p4 = scmp.lt.s32.totalorder %s1884_s23, %s1884_s23 }
  0x86   : > { %p1887_p10 = pnand %p1885_p3, %p1873_p12  ;;  %p1894_p13 = por %p1893_p4, %p1892_p11 }
  0x88   : > { %p1888_p7 = pneg %p1887_p10 }
  0x8a   : > { %p1895_p8 = pnand %p1894_p13, %p1888_p7 }
  0x8c   : > { %1898 = shalt.err (!%p1895_p8)
}
  0x8d   : > { %s2077_s18 = smov 64   ;;  %s2078_s19 = smov 4  }
  0x8e   : > { %1636 = dma.hbm_to_vmem [thread:$0]  (!%p2843_p9), %s2795_s0, 512, %s2318_s20, [#allocation6], %s2077_s18, %s2077_s18, %s2078_s19  }
  0x8f   : > { %s1899_s3 = scalar_lea.hbm %s2316_s16, 4096  ;;  %p2844_p12 = scmp.ne.s32.totalorder %s2832_s25, 0 }
  0x90   : > { %p1900_p2 = scmp.ne.s32.totalorder %s2316_s16, %s1899_s3  ;;  %s1904_s1 = scalar_lea.hbm %s2799_s4, 8192 }
  0x91   : > { %p1905_p8 = scmp.lt.u32.totalorder %s2316_s16, %s2799_s4  ;;  %p1906_p1 = scmp.lt.u32.totalorder %s1904_s1, %s1899_s3 }
  0x92   : > { %p1902_p0 = pnand %p1900_p2, %p2844_p12  ;;  %p1908_p5 = scmp.lt.u32.totalorder %s1899_s3, %s2316_s16 }
  0x93   : > { %p1907_p6 = por %p1906_p1, %p1905_p8 }
  0x94   : > { %p1903_p13 = pneg %p1902_p0 }
  0x95   : > { %p1909_p3 = por %p1908_p5, %p1907_p6 }
  0x97   : > { %p1910_p10 = pnand %p1909_p3, %p1903_p13 }
  0x99   : > { %1913 = shalt.err (!%p1910_p10)
}
  0x9a   : > { %s1914_s21 = scalar_lea.vmem %s2273_s13, 4096  ;;  %s2079_s20 = smov [#allocation13]  }
  0x9b   : > { %p1915_p9 = scmp.ne.s32.totalorder %s2273_s13, %s1914_s21  ;;  %s1919_s15 = sshll.u32 %s2079_s20, 4  ;;  %s1920_s15 = int_to_ptr.vmem [resolvable:$false] %s1919_s15 }
  0x9c   : > { %s1921_s23 = scalar_lea.vmem %s1920_s15, 8192  ;;  %p1922_p4 = scmp.lt.s32.totalorder %s2273_s13, %s1920_s15 }
  0x9d   : > { %p1917_p7 = pnand %p1915_p9, %p2844_p12  ;;  %p1923_p2 = scmp.lt.s32.totalorder %s1921_s23, %s1914_s21 }
  0x9f   : > { %p1918_p11 = pneg %p1917_p7  ;;  %p1924_p0 = por %p1923_p2, %p1922_p4 }
  0xa1   : > { %p1925_p8 = pnand %p1924_p0, %p1918_p11 }
  0xa3   : > { %1928 = shalt.err (!%p1925_p8)
}
  0xa4   : > { %p2845_p13 = scmp.ne.s32.totalorder %s2831_s22, 0  ;;  %s2846_s18 = smov 16  }
  0xa5   : > { %s2847_s19 = smov 256   ;;  %p2848_p12 = scmp.ne.s32.totalorder %s2840_s12, 0 }
  0xa6   : > { %1649 = dma.hbm_to_vmem [thread:$0]  (!%p2845_p13), %s2316_s16, 4096, %s2273_s13, %s2245_s14, %s2847_s19, %s2847_s19, %s2846_s18  }
  0xa7   : > { %372 = sbr.rel (%p2848_p12) target bundleno = 849 (0x351), region = 44  ;;  %p2849_p1 = scmp.eq.s32.totalorder (!%p2848_p12), %s2276_s24, 0 }
  0xae   : > { %2032 = dma.done.wait (%p2849_p1), [#allocation6], 512   ;;  %p2850_p6 = pmov %p2849_p1 }
  0xaf   : > { %s2400_s22 = sand.u32 1, %s2276_s24   ;;  %s380_s25 = sand.u32 1, %s2057_s28  }
  0xb0   : > { %2034 = vsyncadd (%p2850_p6), [#allocation6], 4294966784  ;;  %s2403_s9 = sshll.u32 %s380_s25, 3  ;;  %s379_s13 = scalar_lea.sflag [#allocation9], %s2400_s22 }
  0xb1   : > { %s382_s14 = scalar_lea.vmem [#allocation8], %s2403_s9  ;;  %p2851_p5 = scmp.ne.s32.totalorder %s2835_s6, 0 }
  0xb3   : > { %2036 = dma.done.wait (%p2851_p5), %s379_s13, 256  }
  0xb4   : > { %2038 = vsyncadd (%p2851_p5), %s379_s13, 4294967040  ;;  %s1521_s12 = sshll.u32 %s380_s25, 8  ;;  %s391_s16 = scalar_lea.vmem [#allocation10], %s2403_s9 }
  0xb5   : > { %s397_s26 = scalar_lea.sflag [#allocation12], %s2400_s22  ;;  %s2413_s3 = scalar_lea.vmem [#allocation11], %s1521_s12 }
  0xb6   : > { %2040 = dma.done.wait (%p2851_p5), %s397_s26, 8192  }
  0xb7   : > { %2042 = vsyncadd (%p2851_p5), %s397_s26, 4294959104  ;;  %p466_p3 = scmp.lt.s32.totalorder %s2276_s24, 1  ;;  %s2426_s21 = scalar_lea.vmem [#allocation13], %s1521_s12 }
  0xb8   : > { %s458_s20 = scalar_lea.vmem [#allocation15], %s2403_s9  ;;  %s465_s15 = scalar_lea.vmem [#allocation17], %s2403_s9 }
  0xb9   : > { %s467_s29 = scalar_select %p466_p3, %s2276_s24, 1 }
  0xba   : > { %p2852_p10 = scmp.ne.s32.totalorder %s2276_s24, 0 }
  0xbb   : > { %s1525_s11 = sshll.u32 %s467_s29, 2  ;;  %v475_v0 = vld [vmem:[#allocation5] sm:$0xff] (!%p2852_p10)   ;;  %v477_v1 = vld [vmem:[#allocation5 + $0x8] sm:$0xff] (!%p2852_p10)   ;;  %v479_v2 = vld [vmem:[#allocation5 + $0x10] sm:$0xff] (!%p2852_p10)  }
  0xbc   : > { %s2424_s27 = scalar_lea.vmem %s2800_s5, %s1525_s11  ;;  %474 = sbr.rel (%p2852_p10) target bundleno = 195 (0xc3), region = 68  ;;  %483 = vst [vmem:[#allocation14] sm:$0xff] (!%p2852_p10), %v475_v0   ;;  %485 = vst [vmem:[#allocation14 + $0x8] sm:$0xff] (!%p2852_p10), %v477_v1   ;;  %v481_v3 = vld [vmem:[#allocation5 + $0x18] sm:$0xff] (!%p2852_p10)  }
  0xbd   : > { %487 = vst [vmem:[#allocation14 + $0x10] sm:$0xff] (!%p2852_p10), %v479_v2   ;;  %489 = vst [vmem:[#allocation14 + $0x18] sm:$0xff] (!%p2852_p10), %v481_v3  }
  0xc3 PF: > { %v1713_v4 = vld [vmem:[%s2413_s3 + $0x4] ss:$16 sps:$4 sm:$0xff]   ;;  %v1715_v5 = vld [vmem:[%s2413_s3 + $0xc] ss:$16 sps:$4 sm:$0xff]   ;;  %v2080_v6 = vmov 0   ;;  %s2613_s6 = smov 0  }
  0xc4   : > { %769 = vmatprep.mubr.bf16.mxu0 %v2080_v6  ;;  %842 = vmatprep.mubr.bf16.mxu1 %v2080_v6  ;;  %v1717_v7 = vld [vmem:[%s2413_s3] ss:$16 sps:$4 sm:$0xff]   ;;  %v1718_v8 = vld [vmem:[%s2413_s3 + $0x8] ss:$16 sps:$4 sm:$0xff]   ;;  %v1719_v9 = vld [vmem:[%s2413_s3 + $0x24] ss:$16 sps:$4 sm:$0xff]  }
  0xc5   : > { %737 = vmatprep.subr.bf16.mxu0 %v1713_v4  ;;  %810 = vmatprep.subr.bf16.mxu1 %v1715_v5  ;;  %v1721_v10 = vld [vmem:[%s2413_s3 + $0x2c] ss:$16 sps:$4 sm:$0xff]   ;;  %v1723_v11 = vld [vmem:[%s2413_s3 + $0x20] ss:$16 sps:$4 sm:$0xff]   ;;  %v1724_v12 = vld [vmem:[%s2413_s3 + $0x28] ss:$16 sps:$4 sm:$0xff]  }
  0xc6   : > { %738 = vmatpush1.bf16.msra.mxu0 %v1717_v7  ;;  %811 = vmatpush1.bf16.msra.mxu1 %v1718_v8  ;;  %v1725_v13 = vld [vmem:[%s2413_s3 + $0x44] ss:$16 sps:$4 sm:$0xff]   ;;  %v1727_v14 = vld [vmem:[%s2413_s3 + $0x4c] ss:$16 sps:$4 sm:$0xff]   ;;  %v1729_v15 = vld [vmem:[%s2413_s3 + $0x40] ss:$16 sps:$4 sm:$0xff]  }
  0xc7   : > { %739 = vmatprep.subr.bf16.mxu0 %v1719_v9  ;;  %812 = vmatprep.subr.bf16.mxu1 %v1721_v10  ;;  %v1730_v16 = vld [vmem:[%s2413_s3 + $0x48] ss:$16 sps:$4 sm:$0xff]   ;;  %v1731_v17 = vld [vmem:[%s2413_s3 + $0x64] ss:$16 sps:$4 sm:$0xff]   ;;  %v1733_v18 = vld [vmem:[%s2413_s3 + $0x6c] ss:$16 sps:$4 sm:$0xff]  }
  0xc8   : > { %v1735_v19 = vld [vmem:[%s2413_s3 + $0x60] ss:$16 sps:$4 sm:$0xff]   ;;  %v1736_v20 = vld [vmem:[%s2413_s3 + $0x68] ss:$16 sps:$4 sm:$0xff]   ;;  %v1737_v21 = vld [vmem:[%s2413_s3 + $0x84] ss:$16 sps:$4 sm:$0xff]  }
  0xc9   : > { %v1739_v22 = vld [vmem:[%s2413_s3 + $0x8c] ss:$16 sps:$4 sm:$0xff]   ;;  %v1741_v23 = vld [vmem:[%s2413_s3 + $0x80] ss:$16 sps:$4 sm:$0xff]   ;;  %v1742_v24 = vld [vmem:[%s2413_s3 + $0x88] ss:$16 sps:$4 sm:$0xff]  }
  0xca   : > { %740 = vmatpush1.bf16.msra.mxu0 %v1723_v11  ;;  %813 = vmatpush1.bf16.msra.mxu1 %v1724_v12  ;;  %v1743_v25 = vld [vmem:[%s2413_s3 + $0xa4] ss:$16 sps:$4 sm:$0xff]   ;;  %v1745_v26 = vld [vmem:[%s2413_s3 + $0xac] ss:$16 sps:$4 sm:$0xff]   ;;  %v1747_v27 = vld [vmem:[%s2413_s3 + $0xa0] ss:$16 sps:$4 sm:$0xff]   ;;  %v533_v11 = vlaneseq }
  0xcb   : > { %741 = vmatprep.subr.bf16.mxu0 %v1725_v13  ;;  %814 = vmatprep.subr.bf16.mxu1 %v1727_v14  ;;  %v1748_v28 = vld [vmem:[%s2413_s3 + $0xa8] ss:$16 sps:$4 sm:$0xff]   ;;  %v1749_v29 = vld [vmem:[%s2413_s3 + $0xc4] ss:$16 sps:$4 sm:$0xff]   ;;  %v1751_v30 = vld [vmem:[%s2413_s3 + $0xcc] ss:$16 sps:$4 sm:$0xff]  }
  0xcc   : > { %v1753_v31 = vld [vmem:[%s2413_s3 + $0xc0] ss:$16 sps:$4 sm:$0xff]   ;;  %v1754_v32 = vld [vmem:[%s2413_s3 + $0xc8] ss:$16 sps:$4 sm:$0xff]   ;;  %v1755_v33 = vld [vmem:[%s2413_s3 + $0xe4] ss:$16 sps:$4 sm:$0xff]  }
  0xcd   : > { %v1757_v34 = vld [vmem:[%s2413_s3 + $0xec] ss:$16 sps:$4 sm:$0xff]   ;;  %v1759_v35 = vld [vmem:[%s2413_s3 + $0xe0] ss:$16 sps:$4 sm:$0xff]   ;;  %v1760_v36 = vld [vmem:[%s2413_s3 + $0xe8] ss:$16 sps:$4 sm:$0xff]  }
  0xce   : > { %742 = vmatpush1.bf16.msra.mxu0 %v1729_v15  ;;  %815 = vmatpush1.bf16.msra.mxu1 %v1730_v16  ;;  %v1761_v37 = vld [vmem:[#allocation14] sm:$0xff]   ;;  %v1762_v38 = vld [vmem:[#allocation14 + $0x8] sm:$0xff]   ;;  %v1763_v39 = vld [vmem:[#allocation14 + $0x10] sm:$0xff]   ;;  %v534_v12 = vshrl.u32 %v533_v11, 7 }
  0xcf   : > { %743 = vmatprep.subr.bf16.mxu0 %v1731_v17  ;;  %816 = vmatprep.subr.bf16.mxu1 %v1733_v18  ;;  %v1764_v40 = vld [vmem:[#allocation14 + $0x18] sm:$0xff]   ;;  %v915_v41 = vld [vmem:[%s382_s14] sm:$0xff]  ;;  %v2483_v45 = vld [vmem:[%s2426_s21 + $0x10] sm:$0xff] }
  0xd0   : > { %v917_v42 = vld [vmem:[%s391_s16] sm:$0xff]  ;;  %916 = vst [vmem:[#allocation3] sm:$0xff] %v915_v41  ;;  %v2477_v43 = vld [vmem:[%s2426_s21] sm:$0xff]  ;;  %v2480_v44 = vld [vmem:[%s2426_s21 + $0x8] sm:$0xff]  ;;  %v535_v13 = vsub.s32 0, %v534_v12  ;;  %v543_v14 = vsub.s32 2, %v534_v12 }
  0xd1   : > { %918 = vst [vmem:[#allocation4] sm:$0xff] %v917_v42  ;;  %v2486_v46 = vld [vmem:[%s2426_s21 + $0x18] sm:$0xff]  ;;  %v2489_v47 = vld [vmem:[%s2426_s21 + $0x20] sm:$0xff]  ;;  %v2492_v48 = vld [vmem:[%s2426_s21 + $0x28] sm:$0xff]  ;;  %v539_v16 = vsub.s32 1, %v534_v12  ;;  %v547_v17 = vsub.s32 3, %v534_v12 }
  0xd2   : > { %744 = vmatpush1.bf16.msra.mxu0 %v1735_v19  ;;  %817 = vmatpush1.bf16.msra.mxu1 %v1736_v20  ;;  %v2495_v49 = vld [vmem:[%s2426_s21 + $0x30] sm:$0xff]  ;;  %v2498_v50 = vld [vmem:[%s2426_s21 + $0x38] sm:$0xff]  ;;  %v2501_v51 = vld [vmem:[%s2426_s21 + $0x40] sm:$0xff] }
  0xd3   : > { %745 = vmatprep.subr.bf16.mxu0 %v1737_v21  ;;  %818 = vmatprep.subr.bf16.mxu1 %v1739_v22  ;;  %v2504_v52 = vld [vmem:[%s2426_s21 + $0x48] sm:$0xff]  ;;  %v2507_v53 = vld [vmem:[%s2426_s21 + $0x50] sm:$0xff]  ;;  %v2510_v54 = vld [vmem:[%s2426_s21 + $0x58] sm:$0xff] }
  0xd4   : > { %v2513_v55 = vld [vmem:[%s2426_s21 + $0x60] sm:$0xff]  ;;  %v2516_v56 = vld [vmem:[%s2426_s21 + $0x68] sm:$0xff]  ;;  %v2519_v57 = vld [vmem:[%s2426_s21 + $0x70] sm:$0xff] }
  0xd5   : > { %v2522_v58 = vld [vmem:[%s2426_s21 + $0x78] sm:$0xff]  ;;  %v2525_v59 = vld [vmem:[%s2426_s21 + $0x80] sm:$0xff]  ;;  %v2528_v60 = vld [vmem:[%s2426_s21 + $0x88] sm:$0xff] }
  0xd6   : > { %746 = vmatpush1.bf16.msra.mxu0 %v1741_v23  ;;  %819 = vmatpush1.bf16.msra.mxu1 %v1742_v24  ;;  %v2531_v61 = vld [vmem:[%s2426_s21 + $0x90] sm:$0xff]  ;;  %v2534_v62 = vld [vmem:[%s2426_s21 + $0x98] sm:$0xff]  ;;  %v2537_v63 = vld [vmem:[%s2426_s21 + $0xa0] sm:$0xff] }
  0xd7   : > { %747 = vmatprep.subr.bf16.mxu0 %v1743_v25  ;;  %820 = vmatprep.subr.bf16.mxu1 %v1745_v26  ;;  %v2540_v0 = vld [vmem:[%s2426_s21 + $0xa8] sm:$0xff]  ;;  %v2543_v1 = vld [vmem:[%s2426_s21 + $0xb0] sm:$0xff]  ;;  %v2546_v2 = vld [vmem:[%s2426_s21 + $0xb8] sm:$0xff] }
  0xd8   : > { %v2549_v3 = vld [vmem:[%s2426_s21 + $0xc0] sm:$0xff]  ;;  %v2552_v4 = vld [vmem:[%s2426_s21 + $0xc8] sm:$0xff]  ;;  %v2555_v5 = vld [vmem:[%s2426_s21 + $0xd0] sm:$0xff] }
  0xd9   : > { %v2561_v7 = vld [vmem:[%s2426_s21 + $0xe0] sm:$0xff]  ;;  %v2564_v8 = vld [vmem:[%s2426_s21 + $0xe8] sm:$0xff]  ;;  %v2567_v9 = vld [vmem:[%s2426_s21 + $0xf0] sm:$0xff] }
  0xda   : > { %748 = vmatpush1.bf16.msra.mxu0 %v1747_v27  ;;  %821 = vmatpush1.bf16.msra.mxu1 %v1748_v28  ;;  %v2570_v10 = vld [vmem:[%s2426_s21 + $0xf8] sm:$0xff]  ;;  %v531_v15 = vld [vmem:[%s2424_s27] sm:$0xf] }
  0xdb   : > { %749 = vmatprep.subr.bf16.mxu0 %v1749_v29  ;;  %822 = vmatprep.subr.bf16.mxu1 %v1751_v30  ;;  %v2573_v18 = vrot.slane %v531_v15, %v535_v13  ;;  %v2575_v19 = vrot.slane %v531_v15, %v543_v14  ;;  %v2577_v20 = vrot.slane %v531_v15, %v539_v16 }
  0xdc   : > { %v2579_v21 = vrot.slane %v531_v15, %v547_v17 }
  0xde   : > { %750 = vmatpush1.bf16.msra.mxu0 %v1753_v31  ;;  %823 = vmatpush1.bf16.msra.mxu1 %v1754_v32 }
  0xdf   : > { %751 = vmatprep.subr.bf16.mxu0 %v1755_v33  ;;  %824 = vmatprep.subr.bf16.mxu1 %v1757_v34 }
  0xe2   : > { %752 = vmatpush1.bf16.msra.mxu0 %v1759_v35  ;;  %825 = vmatpush1.bf16.msra.mxu1 %v1760_v36 }
  0xe5   : > { %770 = vmatmul.mubr.bf16.vlgmr.msra.gmra.mrb[0].mxu0 %v1761_v37  ;;  %843 = vmatmul.mubr.bf16.vlgmr.msra.gmra.mrb[0].mxu1 %v1761_v37 }
  0xe6   : > { %779 = vmatprep.mubr.bf16.mxu0 %v2080_v6  ;;  %852 = vmatprep.mubr.bf16.mxu1 %v2080_v6 }
  0xed   : > { %780 = vmatmul.mubr.bf16.gmra.mrb[4].mxu0 %v1762_v38  ;;  %853 = vmatmul.mubr.bf16.gmra.mrb[4].mxu1 %v1762_v38 }
  0xee   : > { %789 = vmatprep.mubr.bf16.mxu0 %v2080_v6  ;;  %862 = vmatprep.mubr.bf16.mxu1 %v2080_v6 }
  0xf5   : > { %790 = vmatmul.mubr.bf16.gmra.mrb[8].mxu0 %v1763_v39  ;;  %863 = vmatmul.mubr.bf16.gmra.mrb[8].mxu1 %v1763_v39 }
  0xf6   : > { %799 = vmatprep.mubr.bf16.mxu0 %v2080_v6  ;;  %872 = vmatprep.mubr.bf16.mxu1 %v2080_v6  ;;  %v2558_v6 = vld [vmem:[%s2426_s21 + $0xd8] sm:$0xff] }
  0xfd   : > { %800 = vmatmul.mubr.bf16.gmra.mrb[12].mxu0 %v1764_v40  ;;  %873 = vmatmul.mubr.bf16.gmra.mrb[12].mxu1 %v1764_v40 }
 0x1b8   : > { %v771_v22 = vpop.f32.mrb[0].mxu0  ;;  %v844_v23 = vpop.f32.mrb[0].mxu1 }
 0x1b9   : > { %v772_v24 = vadd.f32 %v771_v22, %v2573_v18  ;;  %v845_v25 = vadd.f32 %v844_v23, %v2575_v19  ;;  %v773_v26 = vpop.f32.mrb[1].mxu0  ;;  %v846_v27 = vpop.f32.mrb[1].mxu1 }
 0x1ba   : > { %v774_v28 = vadd.f32 %v773_v26, %v2577_v20  ;;  %v847_v29 = vadd.f32 %v846_v27, %v2579_v21  ;;  %v775_v30 = vpop.f32.mrb[2].mxu0  ;;  %v848_v31 = vpop.f32.mrb[2].mxu1 }
 0x1bb   : > { %883 = vst [vmem:[#allocation2] sm:$0xff] %v772_v24  ;;  %885 = vst [vmem:[#allocation2 + $0x10] sm:$0xff] %v845_v25  ;;  %v776_v32 = vadd.f32 %v775_v30, %v2573_v18  ;;  %v849_v33 = vadd.f32 %v848_v31, %v2575_v19  ;;  %v777_v34 = vpop.f32.mrb[3].mxu0  ;;  %v850_v35 = vpop.f32.mrb[3].mxu1 }
 0x1bc   : > { %884 = vst [vmem:[#allocation2 + $0x8] sm:$0xff] %v774_v28  ;;  %886 = vst [vmem:[#allocation2 + $0x18] sm:$0xff] %v847_v29  ;;  %v778_v36 = vadd.f32 %v777_v34, %v2577_v20  ;;  %v851_v37 = vadd.f32 %v850_v35, %v2579_v21 }
 0x1bd   : > { %887 = vst [vmem:[#allocation2 + $0x20] sm:$0xff] %v776_v32  ;;  %889 = vst [vmem:[#allocation2 + $0x30] sm:$0xff] %v849_v33 }
 0x1be   : > { %888 = vst [vmem:[#allocation2 + $0x28] sm:$0xff] %v778_v36  ;;  %890 = vst [vmem:[#allocation2 + $0x38] sm:$0xff] %v851_v37 }
 0x1c0   : > { %v781_v38 = vpop.f32.mrb[4].mxu0  ;;  %v854_v39 = vpop.f32.mrb[4].mxu1 }
 0x1c1   : > { %v782_v40 = vadd.f32 %v781_v38, %v2573_v18  ;;  %v855_v41 = vadd.f32 %v854_v39, %v2575_v19  ;;  %v783_v42 = vpop.f32.mrb[5].mxu0  ;;  %v856_v11 = vpop.f32.mrb[5].mxu1 }
 0x1c2   : > { %v784_v12 = vadd.f32 %v783_v42, %v2577_v20  ;;  %v857_v13 = vadd.f32 %v856_v11, %v2579_v21  ;;  %v785_v14 = vpop.f32.mrb[6].mxu0  ;;  %v858_v15 = vpop.f32.mrb[6].mxu1 }
 0x1c3   : > { %891 = vst [vmem:[#allocation2 + $0x40] sm:$0xff] %v782_v40  ;;  %893 = vst [vmem:[#allocation2 + $0x50] sm:$0xff] %v855_v41  ;;  %v786_v16 = vadd.f32 %v785_v14, %v2573_v18  ;;  %v859_v17 = vadd.f32 %v858_v15, %v2575_v19  ;;  %v787_v22 = vpop.f32.mrb[7].mxu0  ;;  %v860_v23 = vpop.f32.mrb[7].mxu1 }
 0x1c4   : > { %892 = vst [vmem:[#allocation2 + $0x48] sm:$0xff] %v784_v12  ;;  %894 = vst [vmem:[#allocation2 + $0x58] sm:$0xff] %v857_v13  ;;  %v788_v24 = vadd.f32 %v787_v22, %v2577_v20  ;;  %v861_v25 = vadd.f32 %v860_v23, %v2579_v21 }
 0x1c5   : > { %895 = vst [vmem:[#allocation2 + $0x60] sm:$0xff] %v786_v16  ;;  %897 = vst [vmem:[#allocation2 + $0x70] sm:$0xff] %v859_v17 }
 0x1c6   : > { %896 = vst [vmem:[#allocation2 + $0x68] sm:$0xff] %v788_v24  ;;  %898 = vst [vmem:[#allocation2 + $0x78] sm:$0xff] %v861_v25 }
 0x1c8   : > { %v791_v26 = vpop.f32.mrb[8].mxu0  ;;  %v864_v27 = vpop.f32.mrb[8].mxu1 }
 0x1c9   : > { %v792_v28 = vadd.f32 %v791_v26, %v2573_v18  ;;  %v865_v29 = vadd.f32 %v864_v27, %v2575_v19  ;;  %v793_v30 = vpop.f32.mrb[9].mxu0  ;;  %v866_v31 = vpop.f32.mrb[9].mxu1 }
 0x1ca   : > { %v794_v32 = vadd.f32 %v793_v30, %v2577_v20  ;;  %v867_v33 = vadd.f32 %v866_v31, %v2579_v21  ;;  %v795_v34 = vpop.f32.mrb[10].mxu0  ;;  %v868_v35 = vpop.f32.mrb[10].mxu1 }
 0x1cb   : > { %899 = vst [vmem:[#allocation2 + $0x80] sm:$0xff] %v792_v28  ;;  %901 = vst [vmem:[#allocation2 + $0x90] sm:$0xff] %v865_v29  ;;  %v796_v36 = vadd.f32 %v795_v34, %v2573_v18  ;;  %v869_v37 = vadd.f32 %v868_v35, %v2575_v19  ;;  %v797_v38 = vpop.f32.mrb[11].mxu0  ;;  %v870_v39 = vpop.f32.mrb[11].mxu1 }
 0x1cc   : > { %900 = vst [vmem:[#allocation2 + $0x88] sm:$0xff] %v794_v32  ;;  %902 = vst [vmem:[#allocation2 + $0x98] sm:$0xff] %v867_v33  ;;  %v798_v40 = vadd.f32 %v797_v38, %v2577_v20  ;;  %v871_v41 = vadd.f32 %v870_v39, %v2579_v21 }
 0x1cd   : > { %903 = vst [vmem:[#allocation2 + $0xa0] sm:$0xff] %v796_v36  ;;  %905 = vst [vmem:[#allocation2 + $0xb0] sm:$0xff] %v869_v37 }
 0x1ce   : > { %904 = vst [vmem:[#allocation2 + $0xa8] sm:$0xff] %v798_v40  ;;  %906 = vst [vmem:[#allocation2 + $0xb8] sm:$0xff] %v871_v41 }
 0x1d0   : > { %v801_v42 = vpop.f32.mrb[12].mxu0  ;;  %v874_v11 = vpop.f32.mrb[12].mxu1 }
 0x1d1   : > { %v802_v12 = vadd.f32 %v801_v42, %v2573_v18  ;;  %v875_v13 = vadd.f32 %v874_v11, %v2575_v19  ;;  %v803_v14 = vpop.f32.mrb[13].mxu0  ;;  %v876_v15 = vpop.f32.mrb[13].mxu1 }
 0x1d2   : > { %v804_v16 = vadd.f32 %v803_v14, %v2577_v20  ;;  %v877_v17 = vadd.f32 %v876_v15, %v2579_v21  ;;  %v805_v22 = vpop.f32.mrb[14].mxu0  ;;  %v878_v23 = vpop.f32.mrb[14].mxu1 }
 0x1d3   : > { %907 = vst [vmem:[#allocation2 + $0xc0] sm:$0xff] %v802_v12  ;;  %909 = vst [vmem:[#allocation2 + $0xd0] sm:$0xff] %v875_v13  ;;  %v806_v24 = vadd.f32 %v805_v22, %v2573_v18  ;;  %v879_v25 = vadd.f32 %v878_v23, %v2575_v19  ;;  %v807_v26 = vpop.f32.mrb[15].mxu0  ;;  %v880_v27 = vpop.f32.mrb[15].mxu1 }
 0x1d4   : > { %908 = vst [vmem:[#allocation2 + $0xc8] sm:$0xff] %v804_v16  ;;  %910 = vst [vmem:[#allocation2 + $0xd8] sm:$0xff] %v877_v17  ;;  %v808_v28 = vadd.f32 %v807_v26, %v2577_v20  ;;  %v881_v29 = vadd.f32 %v880_v27, %v2579_v21 }
 0x1d5   : > { %911 = vst [vmem:[#allocation2 + $0xe0] sm:$0xff] %v806_v24  ;;  %913 = vst [vmem:[#allocation2 + $0xf0] sm:$0xff] %v879_v25 }
 0x1d6   : > { %912 = vst [vmem:[#allocation2 + $0xe8] sm:$0xff] %v808_v28  ;;  %914 = vst [vmem:[#allocation2 + $0xf8] sm:$0xff] %v881_v29 }
 0x1d7 LB: >> { %v1567_v18 = vcombine.high %v2477_v43, %v2483_v45  ;;  %v1566_v19 = vcombine.low %v2477_v43, %v2483_v45  ;;  %v1571_v20 = vcombine.high %v2489_v47, %v2495_v49  ;;  %v1569_v21 = vcombine.high %v2480_v44, %v2486_v46  ;;  %s1563_s23 = sshll.u32 %s2069_s6, 3  ;;  %s956_s6 = sadd.s32 1, %s2069_s6   ;;  %s2069_s6 = sphi %s2613_s6, %s956_s6  }
 0x1d8   : >> { %v1568_v30 = vcombine.low %v2480_v44, %v2486_v46  ;;  %v1573_v31 = vcombine.high %v2492_v48, %v2498_v50  ;;  %v1570_v32 = vcombine.low %v2489_v47, %v2495_v49  ;;  %v1575_v33 = vcombine.high %v2501_v51, %v2507_v53  ;;  %s2683_s18 = sshra.s32 %s1563_s23, 3  ;;  %p953_p9 = scmp.ge.s32.totalorder %s956_s6, 8  }
 0x1d9   : >> { %1130 = vmatprep.subr.bf16.mxu0 %v1567_v18  ;;  %1171 = vmatprep.subr.bf16.mxu1 %v1569_v21  ;;  %v1572_v34 = vcombine.low %v2492_v48, %v2498_v50  ;;  %v1577_v35 = vcombine.high %v2504_v52, %v2510_v54  ;;  %v2081_v36 = vmov 0   ;;  %v1574_v37 = vcombine.low %v2501_v51, %v2507_v53  ;;  %v958_v18 = vld [vmem:[#allocation3] sm:$0xff]  ;;  %s1612_s19 = sshll.u32 %s2683_s18, 5  ;;  %s1601_s13 = sshll.u32 %s2683_s18, 2 }
 0x1da   : >> { %1131 = vmatpush1.bf16.msra.mxu0 %v1566_v19  ;;  %1172 = vmatpush1.bf16.msra.mxu1 %v1568_v30  ;;  %v1579_v38 = vcombine.high %v2513_v55, %v2519_v57  ;;  %v1576_v39 = vcombine.low %v2504_v52, %v2510_v54  ;;  %v1581_v40 = vcombine.high %v2516_v56, %v2522_v58  ;;  %s964_s25 = scalar_lea.vmem [#allocation2], %s1612_s19  ;;  %s1244_s14 = scalar_lea.vmem [#allocation14], %s1601_s13 }
 0x1db   : >> { %1132 = vmatprep.subr.bf16.mxu0 %v1571_v20  ;;  %1173 = vmatprep.subr.bf16.mxu1 %v1573_v31  ;;  %v1578_v41 = vcombine.low %v2513_v55, %v2519_v57  ;;  %v1583_v42 = vcombine.high %v2525_v59, %v2531_v61  ;;  %v1580_v11 = vcombine.low %v2516_v56, %v2522_v58  ;;  %s1605_s12 = sshll.u32 (%p953_p9), %s2276_s24, 7  ;;  %s1282_s29 = sshll.u32 (%p953_p9), %s458_s20, 4  ;;  %s2702_s29 = int_to_ptr.vmem [resolvable:$true] %s1282_s29 }
 0x1dc   : >> { %1162 = vmatprep.mubr.bf16.mxu0 %v2081_v36  ;;  %1203 = vmatprep.mubr.bf16.mxu1 %v2081_v36  ;;  %v1585_v12 = vcombine.high %v2528_v60, %v2534_v62  ;;  %v1582_v13 = vcombine.low %v2525_v59, %v2531_v61  ;;  %v1587_v14 = vcombine.high %v2537_v63, %v2543_v1  ;;  %s2698_s3 = scalar_lea.hbm (%p953_p9), %s2802_s7, %s1605_s12  ;;  %s2707_s17 = scalar_lea.hbm (%p953_p9), %s2803_s8, %s1605_s12 }
 0x1dd   : >> { %v1584_v15 = vcombine.low %v2528_v60, %v2534_v62  ;;  %v1589_v16 = vcombine.high %v2540_v0, %v2546_v2  ;;  %v1586_v17 = vcombine.low %v2537_v63, %v2543_v1  ;;  %v1591_v22 = vcombine.high %v2549_v3, %v2555_v5  ;;  %v965_v21 = vld [vmem:[%s964_s25] sm:$0xff]  ;;  %v966_v30 = vld [vmem:[%s964_s25 + $0x8] sm:$0xff]  ;;  %s1251_s27 = scalar_lea.sflag (%p953_p9), [#allocation16], %s2400_s22  ;;  %s1929_s21 = scalar_lea.vmem (%p953_p9), %s2702_s29, 128 }
 0x1de   : >> { %1133 = vmatpush1.bf16.msra.mxu0 %v1570_v32  ;;  %1174 = vmatpush1.bf16.msra.mxu1 %v1572_v34  ;;  %v1588_v23 = vcombine.low %v2540_v0, %v2546_v2  ;;  %v1593_v24 = vcombine.high %v2552_v4, %v2558_v6  ;;  %v1590_v25 = vcombine.low %v2549_v3, %v2555_v5  ;;  %p1930_p7 = scmp.ne.s32.totalorder (%p953_p9), %s2702_s29, %s1929_s21  ;;  %p2853_p11 = scmp.ne.s32.totalorder (%p953_p9), %s2837_s10, 0 }
 0x1df   : >> { %1134 = vmatprep.subr.bf16.mxu0 %v1575_v33  ;;  %1175 = vmatprep.subr.bf16.mxu1 %v1577_v35  ;;  %v1595_v26 = vcombine.high %v2561_v7, %v2567_v9  ;;  %v1592_v27 = vcombine.low %v2552_v4, %v2558_v6  ;;  %v1597_v28 = vcombine.high %v2564_v8, %v2570_v10  ;;  %s2082_s6 = smov (%p953_p9), [#allocation15]  }
 0x1e0   : >> { %v1594_v29 = vcombine.low %v2561_v7, %v2567_v9  ;;  %v1596_v19 = vcombine.low %v2564_v8, %v2570_v10  ;;  %v969_v20 = vpack.c.bf16 %v958_v18, %v958_v18  ;;  %p1931_p4 = pnand (%p953_p9), %p1930_p7, %p2853_p11  ;;  %s1933_s23 = sshll.u32 (%p953_p9), %s2082_s6, 4  ;;  %s1934_s23 = int_to_ptr.vmem [resolvable:$false] %s1933_s23 }
 0x1e1   : > { %p1936_p0 = scmp.lt.s32.totalorder (%p953_p9), %s2702_s29, %s1934_s23 }
 0x1e2   : >> { %1135 = vmatpush1.bf16.msra.mxu0 %v1574_v37  ;;  %1176 = vmatpush1.bf16.msra.mxu1 %v1576_v39  ;;  %p1932_p2 = pneg (%p953_p9), %p1931_p4 }
 0x1e3   : >> { %1136 = vmatprep.subr.bf16.mxu0 %v1579_v38  ;;  %1177 = vmatprep.subr.bf16.mxu1 %v1581_v40 }
 0x1e6   : >> { %1137 = vmatpush1.bf16.msra.mxu0 %v1578_v41  ;;  %1178 = vmatpush1.bf16.msra.mxu1 %v1580_v11 }
 0x1e7   : >> { %1138 = vmatprep.subr.bf16.mxu0 %v1583_v42  ;;  %1179 = vmatprep.subr.bf16.mxu1 %v1585_v12  ;;  %v968_v42 = vld [vmem:[%s964_s25 + $0x18] sm:$0xff] }
 0x1ea   : >> { %1139 = vmatpush1.bf16.msra.mxu0 %v1582_v13  ;;  %1180 = vmatpush1.bf16.msra.mxu1 %v1584_v15  ;;  %v967_v13 = vld [vmem:[%s964_s25 + $0x10] sm:$0xff] }
 0x1eb   : >> { %1140 = vmatprep.subr.bf16.mxu0 %v1587_v14  ;;  %1181 = vmatprep.subr.bf16.mxu1 %v1589_v16 }
 0x1ee   : >> { %1141 = vmatpush1.bf16.msra.mxu0 %v1586_v17  ;;  %1182 = vmatpush1.bf16.msra.mxu1 %v1588_v23 }
 0x1ef   : >> { %1142 = vmatprep.subr.bf16.mxu0 %v1591_v22  ;;  %1183 = vmatprep.subr.bf16.mxu1 %v1593_v24 }
 0x1f2   : >> { %1143 = vmatpush1.bf16.msra.mxu0 %v1590_v25  ;;  %1184 = vmatpush1.bf16.msra.mxu1 %v1592_v27 }
 0x1f3   : >> { %1144 = vmatprep.subr.bf16.mxu0 %v1595_v26  ;;  %1185 = vmatprep.subr.bf16.mxu1 %v1597_v28  ;;  %v959_v26 = vld [vmem:[#allocation4] sm:$0xff] }
 0x1f6   : >> { %1145 = vmatpush1.bf16.msra.mxu0 %v1594_v29  ;;  %1186 = vmatpush1.bf16.msra.mxu1 %v1596_v19 }
 0x1f9   : >> { %1163 = vmatmul.mubr.bf16.vlgmr.msra.gmra.mrb[0].mxu0 %v969_v20  ;;  %1204 = vmatmul.mubr.bf16.vlgmr.msra.gmra.mrb[0].mxu1 %v969_v20 }
 0x2cc   : >> { %v1164_v31 = vpop.f32.mrb[0].mxu0  ;;  %v1205_v34 = vpop.f32.mrb[0].mxu1 }
 0x2cd   : >> { %v1212_v32 = vadd.f32 %v1164_v31, %v965_v21  ;;  %v1166_v33 = vpop.f32.mrb[1].mxu0  ;;  %v1207_v37 = vpop.f32.mrb[1].mxu1  ;;  %v1214_v15 = vadd.f32 %v1205_v34, %v967_v13 }
 0x2ce   : >> { %v1213_v35 = vadd.f32 %v1166_v33, %v966_v30  ;;  %v1168_v36 = vpop.f32.mrb[2].mxu0  ;;  %v1209_v40 = vpop.f32.mrb[2].mxu1  ;;  %v1215_v12 = vadd.f32 %v1207_v37, %v968_v42 }
 0x2cf   : >> { %v1598_v38 = vmul.f32 -1.442695, %v1212_v32  ;;  %v1169_v39 = vpop.f32.mrb[3].mxu0  ;;  %v1210_v11 = vpop.f32.mrb[3].mxu1 }
 0x2d0   : >> { %v1599_v41 = vmul.f32 -1.442695, %v1213_v35  ;;  %v1600_v14 = vmul.f32 -1.442695, %v1215_v12 }
 0x2d1   : >> { %1765 = vpow2.f32 %v1598_v38 }
 0x2d2   : >> { %1767 = vpow2.f32 %v1599_v41 }
 0x2d3   : >> { %1769 = vpow2.f32 %v1600_v14 }
 0x2d4   : >> { %1771 = vtanh.f32 %v1214_v15 }
 0x2db   : >> { %v1766_v16 = vpop.eup %1765 }
 0x2dc   : >> { %v1768_v17 = vpop.eup %1767  ;;  %v1219_v22 = vadd.f32 1.0, %v1766_v16 }
 0x2dd   : >> { %v1225_v23 = vadd.f32 1.0, %v1768_v17  ;;  %v1770_v24 = vpop.eup %1769 }
 0x2de   : >> { %1773 = vrcp.f32 %v1219_v22  ;;  %v1772_v25 = vpop.eup %1771  ;;  %v1232_v28 = vadd.f32 1.0, %v1770_v24 }
 0x2df   : >> { %1775 = vrcp.f32 %v1225_v23 }
 0x2e0   : >> { %1777 = vrcp.f32 %v1232_v28 }
 0x2e8   : >> { %v1774_v27 = vpop.eup %1773 }
 0x2e9   : >> { %v1776_v29 = vpop.eup %1775  ;;  %v1236_v18 = vmul.f32 %v1774_v27, %v1772_v25 }
 0x2ea   : >> { %v1235_v19 = vmul.f32 %v1776_v29, %v959_v26  ;;  %v1778_v21 = vpop.eup %1777 }
 0x2ec   : >> { %v1237_v20 = vadd.f32 %v1236_v18, %v1235_v19 }
 0x2ee   : >> { %1779 = vtanh.f32 %v1237_v20  ;;  %1241 = vst [vmem:[#allocation4] sm:$0xff] %v1237_v20 }
 0x2f5   : > { %v1248_v34 = vld [vmem:[#allocation4] sm:$0xff] (%p953_p9) }
 0x2f6   : > { %1249 = vst [vmem:[%s465_s15] sm:$0xff] (%p953_p9), %v1248_v34 }
 0x2f7   : > { %955 = sbr.rel (!%p953_p9) target bundleno = 471 (0x1d7), region = 169 }
 0x2f8   : >> { %v1780_v30 = vpop.eup %1779 }
 0x2f9   : >> { %v1239_v31 = vmul.f32 %v1780_v30, %v1778_v21 }
 0x2fb   : >> { %1240 = vst [vmem:[#allocation3] sm:$0xff] %v1239_v31  ;;  %v1242_v32 = vpack.c.bf16 %v1239_v31, %v1239_v31 }
 0x2fd   : >> { %1245 = vst [vmem:[%s1244_s14] sm:$0xf] %v1242_v32 }
 0x302   : > { %v1246_v33 = vld [vmem:[#allocation3] sm:$0xff] }
 0x303   : > { %1247 = vst [vmem:[%s458_s20] sm:$0xff] %v1246_v33  ;;  %s1935_s20 = scalar_lea.vmem %s1934_s23, 256 }
 0x304   : > { %p1937_p8 = scmp.lt.s32.totalorder %s1935_s20, %s1929_s21 }
 0x306   : > { %p1938_p13 = por %p1937_p8, %p1936_p0 }
 0x308   : > { %p1939_p12 = pnand %p1938_p13, %p1932_p2 }
 0x30a   : > { %1942 = shalt.err (!%p1939_p12)
}
 0x30b   : > { %s1943_s18 = scalar_lea.hbm %s2698_s3, 128  ;;  %s1947_s13 = scalar_lea.hbm %s2802_s7, 256 }
 0x30c   : > { %p1944_p1 = scmp.ne.s32.totalorder %s2698_s3, %s1943_s18  ;;  %p1948_p3 = scmp.lt.u32.totalorder %s2698_s3, %s2802_s7 }
 0x30d   : > { %p1949_p10 = scmp.lt.u32.totalorder %s1947_s13, %s1943_s18  ;;  %p1951_p7 = scmp.lt.u32.totalorder %s1943_s18, %s2698_s3 }
 0x30e   : > { %p1945_p6 = pnand %p1944_p1, %p2853_p11 }
 0x30f   : > { %p1950_p9 = por %p1949_p10, %p1948_p3 }
 0x310   : > { %p1946_p5 = pneg %p1945_p6 }
 0x311   : > { %p1952_p4 = por %p1951_p7, %p1950_p9 }
 0x313   : > { %p1953_p2 = pnand %p1952_p4, %p1946_p5 }
 0x315   : > { %1956 = shalt.err (!%p1953_p2)
}
 0x316   : > { %1627 = dma.vmem_to_hbm [thread:$0]  (%p2853_p11), %s2702_s29, 128, %s2698_s3, %s1251_s27  }
 0x317   : > { %s2083_s16 = smov [#allocation14]   ;;  %p2854_p8 = scmp.eq.s32.totalorder %s2276_s24, 1 }
 0x318   : > { %s1266_s26 = sshll.u32 %s2083_s16, 4  ;;  %s1267_s26 = int_to_ptr.vmem [resolvable:$true] %s1266_s26 }
 0x319   : > { %s1957_s11 = scalar_lea.vmem %s1267_s26, 512  ;;  %p1964_p1 = scmp.lt.s32.totalorder %s1267_s26, %s1267_s26 }
 0x31a   : > { %p1958_p0 = scmp.ne.s32.totalorder %s1267_s26, %s1957_s11  ;;  %p1965_p6 = scmp.lt.s32.totalorder %s1957_s11, %s1957_s11 }
 0x31c   : > { %p1959_p13 = pnand %p1958_p0, %p2854_p8  ;;  %p1966_p5 = por %p1965_p6, %p1964_p1 }
 0x31e   : > { %p1960_p12 = pneg %p1959_p13 }
 0x320   : > { %p1967_p3 = pnand %p1966_p5, %p1960_p12 }
 0x322   : > { %1970 = shalt.err (!%p1967_p3)
}
 0x323   : > { %s2855_s6 = sld [smem:[#allocation29_spill]]  ;;  %p2856_p9 = pmov %p2854_p8 }
 0x329   : > { %s1971_s23 = scalar_lea.hbm %s2855_s6, 512 }
 0x32a   : > { %p1972_p10 = scmp.ne.s32.totalorder %s2855_s6, %s1971_s23  ;;  %p1977_p2 = scmp.lt.u32.totalorder %s1971_s23, %s2855_s6 }
 0x32c   : > { %p1973_p7 = pnand %p1972_p10, %p2856_p9 }
 0x32e   : > { %p1974_p4 = pneg %p1973_p7 }
 0x330   : > { %p1979_p0 = pnand %p1977_p2, %p1974_p4 }
 0x332   : > { %1982 = shalt.err (!%p1979_p0)
}
 0x333   : > { %s2084_s19 = smov 64   ;;  %s2085_s25 = smov 4  }
 0x334   : > { %1626 = dma.vmem_to_hbm [thread:$0]  (%p2854_p8), %s1267_s26, 512, %s2855_s6, [#allocation7], %s2084_s19, %s2084_s19, %s2085_s25  }
 0x335   : > { %s1295_s12 = sshll.u32 %s465_s15, 4  ;;  %s2086_s11 = smov [#allocation17]   ;;  %s1296_s12 = int_to_ptr.vmem [resolvable:$true] %s1295_s12 }
 0x336   : > { %s1983_s16 = scalar_lea.vmem %s1296_s12, 128  ;;  %s1987_s1 = sshll.u32 %s2086_s11, 4  ;;  %s1988_s1 = int_to_ptr.vmem [resolvable:$false] %s1987_s1 }
 0x337   : > { %p1984_p13 = scmp.ne.s32.totalorder %s1296_s12, %s1983_s16  ;;  %s1989_s21 = scalar_lea.vmem %s1988_s1, 256 }
 0x338   : > { %p1990_p6 = scmp.lt.s32.totalorder %s1296_s12, %s1988_s1  ;;  %p1991_p5 = scmp.lt.s32.totalorder %s1989_s21, %s1983_s16 }
 0x339   : > { %p1985_p12 = pnand %p1984_p13, %p2853_p11 }
 0x33a   : > { %p1992_p3 = por %p1991_p5, %p1990_p6 }
 0x33b   : > { %p1986_p1 = pneg %p1985_p12 }
 0x33d   : > { %p1993_p10 = pnand %p1992_p3, %p1986_p1 }
 0x33f   : > { %1996 = shalt.err (!%p1993_p10)
}
 0x340   : > { %s1997_s9 = scalar_lea.hbm %s2707_s17, 128  ;;  %s2001_s23 = scalar_lea.hbm %s2803_s8, 256 }
 0x341   : > { %p1998_p9 = scmp.ne.s32.totalorder %s2707_s17, %s1997_s9  ;;  %p2002_p2 = scmp.lt.u32.totalorder %s2707_s17, %s2803_s8 }
 0x342   : > { %p2003_p0 = scmp.lt.u32.totalorder %s2001_s23, %s1997_s9  ;;  %p2005_p13 = scmp.lt.u32.totalorder %s1997_s9, %s2707_s17 }
 0x343   : > { %p1999_p7 = pnand %p1998_p9, %p2853_p11 }
 0x344   : > { %p2004_p8 = por %p2003_p0, %p2002_p2 }
 0x345   : > { %p2000_p4 = pneg %p1999_p7 }
 0x346   : > { %p2006_p12 = por %p2005_p13, %p2004_p8 }
 0x348   : > { %p2007_p1 = pnand %p2006_p12, %p2000_p4 }
 0x34a   : > { %2010 = shalt.err (!%p2007_p1)
}
 0x34b   : > { %1628 = dma.vmem_to_hbm [thread:$0]  (%p2853_p11), %s1296_s12, 128, %s2707_s17, %s1251_s27  }
 0x34c   : > { %p2857_p6 = scmp.eq.s32.totalorder %s2276_s24, 1 }
 0x34e   : > { %2044 = dma.done.wait (%p2857_p6), [#allocation7], 512   ;;  %p2858_p5 = pmov %p2857_p6 }
 0x350   : > { %2046 = vsyncadd (%p2858_p5), [#allocation7], 4294966784 }
 0x351 PF: > { %s2859_s29 = sadd.s32 4294967294, %s2065_s30   ;;  %s2860_s18 = sld [smem:[#allocation26_spill]] }
 0x352   : > { %s1311_s19 = sand.u32 1, %s2859_s29   ;;  %p2862_p10 = scmp.ge.s32.totalorder %s2065_s30, 2 }
 0x353   : > { %s1312_s10 = scalar_lea.sflag [#allocation16], %s1311_s19 }
 0x357   : > { %p2861_p3 = scmp.ne.s32.totalorder %s2860_s18, 0 }
 0x359   : > { %p1651_p9 = pnand %p2862_p10, %p2861_p3 }
 0x35b   : > { %2048 = dma.done.wait (!%p1651_p9), %s1312_s10, 256  }
 0x35c   : > { %2050 = vsyncadd (!%p1651_p9), %s1312_s10, 4294967040  ;;  %s2863_s30 = sld [smem:[#allocation24_spill]]  ;;  %s2864_s22 = sld [smem:[#allocation23_spill]] }
 0x35d   : > { %s2865_s29 = sld [smem:[#allocation25_spill]]  ;;  %s2866_s27 = smov %s2057_s28 }
 0x362   : > { %p27_p11 = scmp.ge.s32.totalorder %s2863_s30, 4   ;;  %s2867_s28 = smov %s2864_s22 }
 0x364   :  { %29 = sbr.rel (!%p27_p11) target bundleno = 13 (0xd), region = 180 }
 0x36b   :  { %1326 = vsyncpa [#allocation6], 1 }
 0x36c   :  { %1328 = vsyncpa [#allocation6 + $0x1], 1 }
 0x36d   :  { %1329 = vsyncpa [#allocation9], 1 }
 0x36e   :  { %1331 = vsyncpa [#allocation9 + $0x1], 1 }
 0x36f   :  { %1332 = vsyncpa [#allocation12], 1 }
 0x370   :  { %1334 = vsyncpa [#allocation12 + $0x1], 1 }
 0x371   :  { %1335 = vsyncpa [#allocation7], 1 }
 0x372   :  { %1337 = vsyncpa [#allocation7 + $0x1], 1 }
 0x373   :  { %1338 = vsyncpa [#allocation16], 1 }
 0x374   :  { %1340 = vsyncpa [#allocation16 + $0x1], 1 }

</bundles_post_ra>
